<compile_context>
chip_gen: v7x
topology: tpu7x:2x2x1
jax: 0.10.0
libtpu: 0.0.40
codegen_flags: <defaults>
</compile_context>

<pallas_src>
import functools

import jax
import jax.numpy as jnp
import numpy as np
from jax.experimental import pallas as pl
from jax.experimental.pallas import tpu as pltpu

LANE = 128


# ------------------------------ Pallas kernel ------------------------------- #

def _bottleneck_kernel(TH, W, S, xp_ref, w1_ref, b1_ref, w2_ref, b2_ref,
                       w3_ref, b3_ref, o_ref, xbuf, qbuf, sem):
    """Fused Bottleneck forward for one (image, row-strip) grid step.

    xp_ref : (N, (H+2)*W, Cin_p) bf16 in HBM (pl.ANY) - H-halo-padded input.
    w1_ref : (Cin_p, Cp)  bf16  BN1-folded 1x1 weights.
    w2_ref : (9, Cp, Cp)  bf16  BN2-folded 3x3 weights, row = kh*3 + kw.
    w3_ref : (Cp, Co_p)   bf16  BN3-folded 1x1 weights.
    b*_ref : (1, C) f32 biases.
    o_ref  : (1, TH*W, Co_p) output strip.
    xbuf   : (2, (TH+2)*W, Cin_p) bf16 double-buffered x strip (incl. halo).
    qbuf   : ((TH+2)*W + 16, Cp) bf16 stage-1 activation strip + zero guards.
    """
    n = pl.program_id(0)
    s = pl.program_id(1)
    M = TH * W             # output rows in this strip (flattened h*w)
    Mh = (TH + 2) * W      # strip rows including the 1-row top/bottom halo
    B = 8                  # aligned zero-guard rows at the front of qbuf
    Cp = qbuf.shape[1]

    slot = s % 2

    def start_strip_dma(strip_idx, buf_slot):
        pltpu.make_async_copy(
            xp_ref.at[n, pl.ds(strip_idx * M, Mh)],
            xbuf.at[buf_slot], sem.at[buf_slot]).start()

    # Prime the strip pipeline at the first strip of every image.
    @pl.when(s == 0)
    def _():
        start_strip_dma(0, 0)

    # Prefetch the next strip of the same image (overlaps this step's compute).
    if S > 1:
        @pl.when(s + 1 < S)
        def _():
            start_strip_dma(s + 1, 1 - slot)

    # Wait for the current strip.
    pltpu.make_async_copy(
        xp_ref.at[n, pl.ds(s * M, Mh)],
        xbuf.at[slot], sem.at[slot]).wait()

    x_strip = xbuf[slot]                                   # (Mh, Cin_p) bf16

    # ---- Stage 1: 1x1 conv + BN1 + ReLU (halo rows recomputed, VMEM only) --
    q1 = jnp.dot(x_strip, w1_ref[...], preferred_element_type=jnp.float32)
    qbuf[pl.ds(B, Mh), :] = jnp.maximum(q1 + b1_ref[...], 0.0
                                        ).astype(jnp.bfloat16)

    # Zero guard rows and the out-of-image halo rows (3x3 conv zero padding).
    zguard = jnp.zeros((B, Cp), jnp.bfloat16)
    qbuf[pl.ds(0, B), :] = zguard
    qbuf[pl.ds(B + Mh, B), :] = zguard

    @pl.when(s == 0)
    def _():
        qbuf[pl.ds(B, W), :] = jnp.zeros((W, Cp), jnp.bfloat16)

    @pl.when(s == S - 1)
    def _():
        qbuf[pl.ds(B + (TH + 1) * W, W), :] = jnp.zeros((W, Cp), jnp.bfloat16)

    # ---- Stage 2: 3x3 conv + BN2 + ReLU as 9 shifted matmuls (no im2col) ---
    # In-kernel column masks kill the W wrap-around of the kw=0 / kw=2 taps.
    col = jax.lax.broadcasted_iota(jnp.int32, (M, 1), 0) % W
    mask_l = (col != 0).astype(jnp.float32)
    mask_r = (col != W - 1).astype(jnp.float32)

    acc = jnp.zeros((M, Cp), jnp.float32)
    for dw in range(3):
        part = jnp.zeros((M, Cp), jnp.float32)
        for dh in range(3):
            xs = qbuf[pl.ds(B - 1 + dh * W + dw, M), :]
            part += jnp.dot(xs, w2_ref[dh * 3 + dw],
                            preferred_element_type=jnp.float32)
        if dw == 0:
            part = part * mask_l
        elif dw == 2:
            part = part * mask_r
        acc += part
    out2 = jnp.maximum(acc + b2_ref[...], 0.0).astype(jnp.bfloat16)

    # ---- Stage 3: 1x1 conv + BN3 + residual + ReLU --------------------------
    y = jnp.dot(out2, w3_ref[...], preferred_element_type=jnp.float32)
    res = x_strip[W:W + M, :].astype(jnp.float32)          # identity shortcut
    o_ref[0] = jnp.maximum(y + b3_ref[...] + res, 0.0).astype(o_ref.dtype)


# ------------------------------ kernel wrapper ------------------------------ #

def fused_bottleneck(xp_flat, w1, b1, w2, b2, w3, b3, *, N, H, W, TH):
    """xp_flat: (N, (H+2)*W, Cin_p) bf16 H-halo-padded, row-flattened input."""
    S = H // TH
    M = TH * W
    Mh = (TH + 2) * W
    Cin_p = xp_flat.shape[-1]
    Cp = w2.shape[-1]
    Co_p = w3.shape[-1]

    kernel = functools.partial(_bottleneck_kernel, TH, W, S)
    return pl.pallas_call(
        kernel,
        out_shape=jax.ShapeDtypeStruct((N, H * W, Co_p), jnp.bfloat16),
        grid_spec=pltpu.PrefetchScalarGridSpec(
            num_scalar_prefetch=0,
            grid=(N, S),
            in_specs=[
                pl.BlockSpec(memory_space=pl.ANY),                 # x (HBM)
                pl.BlockSpec((Cin_p, Cp), lambda n, s: (0, 0)),    # w1
                pl.BlockSpec((1, Cp), lambda n, s: (0, 0)),        # b1
                pl.BlockSpec((9, Cp, Cp), lambda n, s: (0, 0, 0)), # w2
                pl.BlockSpec((1, Cp), lambda n, s: (0, 0)),        # b2
                pl.BlockSpec((Cp, Co_p), lambda n, s: (0, 0)),     # w3
                pl.BlockSpec((1, Co_p), lambda n, s: (0, 0)),      # b3
            ],
            out_specs=pl.BlockSpec((1, M, Co_p), lambda n, s: (n, s, 0)),
            scratch_shapes=[
                pltpu.VMEM((2, Mh, Cin_p), jnp.bfloat16),  # x strip (dbl buf)
                pltpu.VMEM((Mh + 16, Cp), jnp.bfloat16),   # stage-1 strip
                pltpu.SemaphoreType.DMA((2,)),
            ],
        ),
        compiler_params=pltpu.CompilerParams(
            dimension_semantics=("parallel", "arbitrary"),
            vmem_limit_bytes=32 * 1024 * 1024),
    )(xp_flat, w1, b1, w2, b2, w3, b3)


# ------------------------------- forward pass ------------------------------- #

def _fold_bn(gamma, beta, mean, var, eps=1e-5):
    scale = gamma * jax.lax.rsqrt(var + eps)
    bias = beta - mean * scale
    return scale, bias


def _round_up(x, m):
    return ((x + m - 1) // m) * m


def _pad_dim(a, axis, target):
    pad = target - a.shape[axis]
    if pad == 0:
        return a
    cfg = [(0, 0)] * a.ndim
    cfg[axis] = (0, pad)
    return jnp.pad(a, cfg)


def _pick_strip_rows(H, W, target_rows=512):
    """Largest row-strip TH dividing H with TH*W <= target_rows and 8-aligned."""
    cands = [t for t in range(1, H + 1)
             if H % t == 0 and (t * W) % 8 == 0 and t * W <= target_rows]
    return max(cands) if cands else H


def bottleneck_forward(x_nhwc, params, stride=1, strip_rows=None):
    """ResNet Bottleneck forward (eval-mode BN), stride=1 identity shortcut."""
    assert stride == 1, "TODO(synk): stride>1 / downsample not implemented"
    N, H, W, Cin = x_nhwc.shape
    planes = params["w1"].shape[1]
    Cout = params["w3"].shape[1]
    assert Cin == Cout, "identity shortcut requires inplanes == planes * 4"

    TH = strip_rows if strip_rows is not None else _pick_strip_rows(H, W)
    assert H % TH == 0, "strip_rows must divide H"

    s1, b1 = _fold_bn(*params["bn1"])
    s2, b2 = _fold_bn(*params["bn2"])
    s3, b3 = _fold_bn(*params["bn3"])

    # Fold BN scales into the conv weights (weights are constants -> free).
    w1f = params["w1"] * s1[None, :]
    w2f = params["w2"] * s2[None, None, None, :]
    w3f = params["w3"] * s3[None, :]

    # Zero-pad every channel dim to a multiple of 128 (lane-dense everywhere).
    Cin_p = _round_up(Cin, LANE)
    Cp = _round_up(planes, LANE)
    Cout_p = _round_up(Cout, LANE)   # == Cin_p on the identity path

    w1f = _pad_dim(_pad_dim(w1f, 0, Cin_p), 1, Cp)
    b1 = _pad_dim(b1, 0, Cp)
    w2f = _pad_dim(_pad_dim(w2f, 2, Cp), 3, Cp)
    b2 = _pad_dim(b2, 0, Cp)
    w3f = _pad_dim(_pad_dim(w3f, 0, Cp), 1, Cout_p)
    b3 = _pad_dim(b3, 0, Cout_p)

    w1_bf = w1f.astype(jnp.bfloat16)
    w2_bf = w2f.reshape(9, Cp, Cp).astype(jnp.bfloat16)   # rows ordered (kh, kw)
    w3_bf = w3f.astype(jnp.bfloat16)
    b1 = b1.reshape(1, Cp).astype(jnp.float32)
    b2 = b2.reshape(1, Cp).astype(jnp.float32)
    b3 = b3.reshape(1, Cout_p).astype(jnp.float32)

    # Single host-side copy: channel pad + bf16 cast + 1-row H halo + flatten.
    x_bf = _pad_dim(x_nhwc, 3, Cin_p).astype(jnp.bfloat16)
    xp = jnp.pad(x_bf, ((0, 0), (1, 1), (0, 0), (0, 0)))
    xp_flat = xp.reshape(N, (H + 2) * W, Cin_p)

    out = fused_bottleneck(xp_flat, w1_bf, b1, w2_bf, b2, w3_bf, b3,
                           N=N, H=H, W=W, TH=TH)
    return out.reshape(N, H, W, Cout_p)[..., :Cout]


# ---------------------------- reference (pure JAX) --------------------------- #

def reference_forward(x_nhwc, params, eps=1e-5):
    def bn(y, p):
        g, b, m, v = p
        return (y - m) / jnp.sqrt(v + eps) * g + b

    out = jax.nn.relu(bn(jnp.einsum("nhwc,co->nhwo", x_nhwc, params["w1"]),
                         params["bn1"]))
    out = jax.lax.conv_general_dilated(
        out, params["w2"], window_strides=(1, 1), padding=((1, 1), (1, 1)),
        dimension_numbers=("NHWC", "HWIO", "NHWC"))
    out = jax.nn.relu(bn(out, params["bn2"]))
    out = bn(jnp.einsum("nhwc,co->nhwo", out, params["w3"]), params["bn3"])
    return jax.nn.relu(out + x_nhwc)


# ----------------------------------- main ------------------------------------ #

if __name__ == "__main__":
    key = jax.random.PRNGKey(0)
    # Real ResNet-101 first-bottleneck widths (lane-friendly), small spatial.
    N, H, W = 2, 16, 16
    planes = 64
    inplanes = planes * 4   # identity shortcut requires inplanes == planes * 4

    keys = jax.random.split(key, 8)

    def bn_params(k, c):
        k1, k2, k3, k4 = jax.random.split(k, 4)
        gamma = 1.0 + 0.1 * jax.random.normal(k1, (c,), jnp.float32)
        beta = 0.1 * jax.random.normal(k2, (c,), jnp.float32)
        rmean = 0.1 * jax.random.normal(k3, (c,), jnp.float32)
        rvar = jnp.abs(jax.random.normal(k4, (c,), jnp.float32)) + 0.5
        return (gamma, beta, rmean, rvar)

    params = {
        "w1": 0.05 * jax.random.normal(keys[0], (inplanes, planes), jnp.float32),
        "w2": 0.05 * jax.random.normal(keys[1], (3, 3, planes, planes), jnp.float32),
        "w3": 0.05 * jax.random.normal(keys[2], (planes, planes * 4), jnp.float32),
        "bn1": bn_params(keys[3], planes),
        "bn2": bn_params(keys[4], planes),
        "bn3": bn_params(keys[5], planes * 4),
    }

    x = jax.random.normal(keys[6], (N, H, W, inplanes), jnp.float32)

    # strip_rows=4 -> 4 row-strips per image: exercises the top/bottom boundary
    # strips, the interior halo recompute and the double-buffered strip DMA.
    out = jax.block_until_ready(
        bottleneck_forward(x, params, stride=1, strip_rows=4))
    ref = jax.block_until_ready(reference_forward(x, params))

    np.testing.assert_allclose(np.asarray(out.astype(jnp.float32)),
                               np.asarray(ref), atol=1e-1, rtol=5e-2)
    print("KERNEL_OK")
</pallas_src>

<mosaic_0001>
module attributes {stable_mosaic.version = 11 : i64} {
  func.func @_bottleneck_kernel(%arg0: i32, %arg1: i32, %arg2: memref<2x288x256xbf16, #tpu.memory_space<any>>, %arg3: memref<256x128xbf16, #tpu.memory_space<vmem>>, %arg4: memref<1x128xf32, #tpu.memory_space<vmem>>, %arg5: memref<9x128x128xbf16, #tpu.memory_space<vmem>>, %arg6: memref<1x128xf32, #tpu.memory_space<vmem>>, %arg7: memref<128x256xbf16, #tpu.memory_space<vmem>>, %arg8: memref<1x256xf32, #tpu.memory_space<vmem>>, %arg9: memref<1x64x256xbf16, #tpu.memory_space<vmem>>, %arg10: memref<2x96x256xbf16, #tpu.memory_space<vmem>>, %arg11: memref<112x128xbf16, #tpu.memory_space<vmem>>, %arg12: memref<2x!tpu.dma_semaphore, #tpu.memory_space<semaphore_mem>>) attributes {dimension_semantics = [#tpu.dimension_semantics<parallel>, #tpu.dimension_semantics<arbitrary>], iteration_bounds = array<i64: 2, 4>, scalar_prefetch = 0 : i64, scratch_operands = 3 : i64, tpu.core_type = #tpu.core_type<tc>, window_params = [{}, {pipeline_mode = #tpu.pipeline_mode<synchronous>, transform_indices = @transform_1, window_bounds = array<i64: 256, 128>}, {pipeline_mode = #tpu.pipeline_mode<synchronous>, transform_indices = @transform_2, window_bounds = array<i64: 1, 128>}, {pipeline_mode = #tpu.pipeline_mode<synchronous>, transform_indices = @transform_3, window_bounds = array<i64: 9, 128, 128>}, {pipeline_mode = #tpu.pipeline_mode<synchronous>, transform_indices = @transform_4, window_bounds = array<i64: 1, 128>}, {pipeline_mode = #tpu.pipeline_mode<synchronous>, transform_indices = @transform_5, window_bounds = array<i64: 128, 256>}, {pipeline_mode = #tpu.pipeline_mode<synchronous>, transform_indices = @transform_6, window_bounds = array<i64: 1, 256>}, {transform_indices = @transform_7, window_bounds = array<i64: 1, 64, 256>}]} {
    %c2_i32 = arith.constant 2 : i32
    %c0_i32 = arith.constant 0 : i32
    %0 = arith.cmpi eq, %c2_i32, %c0_i32 : i32
    %c1_i32 = arith.constant 1 : i32
    %1 = arith.select %0, %c1_i32, %c2_i32 : i32
    %2 = arith.remsi %arg1, %1 : i32
    %c0_i32_0 = arith.constant 0 : i32
    %3 = arith.cmpi ne, %2, %c0_i32_0 : i32
    %c0_i32_1 = arith.constant 0 : i32
    %4 = arith.cmpi slt, %2, %c0_i32_1 : i32
    %c0_i32_2 = arith.constant 0 : i32
    %5 = arith.cmpi slt, %1, %c0_i32_2 : i32
    %6 = arith.xori %4, %5 : i1
    %7 = arith.andi %6, %3 : i1
    %8 = arith.addi %2, %1 : i32
    %9 = arith.select %7, %8, %2 : i32
    %c0_i32_3 = arith.constant 0 : i32
    %10 = arith.cmpi eq, %arg1, %c0_i32_3 : i32
    %11 = arith.extui %10 : i1 to i32
    %c0_i32_4 = arith.constant 0 : i32
    %12 = arith.cmpi ne, %11, %c0_i32_4 : i32
    scf.if %12 {
      %c0_i32_86 = arith.constant 0 : i32
      %c0_i32_87 = arith.constant 0 : i32
      %c0_i32_88 = arith.constant 0 : i32
      %c0_i32_89 = arith.constant 0 : i32
      %146 = tpu.memref_slice %arg2[%arg0, %c0_i32_88, %c0_i32_89] : memref<2x288x256xbf16, #tpu.memory_space<any>> -> memref<1x96x256xbf16, #tpu.memory_space<any>>
      %147 = tpu.memref_squeeze %146 : memref<1x96x256xbf16, #tpu.memory_space<any>> -> memref<96x256xbf16, #tpu.memory_space<any>>
      %c0_i32_90 = arith.constant 0 : i32
      %c0_i32_91 = arith.constant 0 : i32
      %148 = tpu.memref_slice %arg10[%c0_i32_86, %c0_i32_90, %c0_i32_91] : memref<2x96x256xbf16, #tpu.memory_space<vmem>> -> memref<1x96x256xbf16, #tpu.memory_space<vmem>>
      %149 = tpu.memref_squeeze %148 : memref<1x96x256xbf16, #tpu.memory_space<vmem>> -> memref<96x256xbf16, #tpu.memory_space<vmem>>
      %150 = tpu.memref_slice %arg12[%c0_i32_87] : memref<2x!tpu.dma_semaphore, #tpu.memory_space<semaphore_mem>> -> memref<1x!tpu.dma_semaphore, #tpu.memory_space<semaphore_mem>>
      %151 = tpu.memref_squeeze %150 : memref<1x!tpu.dma_semaphore, #tpu.memory_space<semaphore_mem>> -> memref<!tpu.dma_semaphore, #tpu.memory_space<semaphore_mem>>
      tpu.enqueue_dma source(%147 : memref<96x256xbf16, #tpu.memory_space<any>>) target(%149 : memref<96x256xbf16, #tpu.memory_space<vmem>>) target_semaphore(%151 : memref<!tpu.dma_semaphore, #tpu.memory_space<semaphore_mem>>)
    } else {
    }
    %c1_i32_5 = arith.constant 1 : i32
    %13 = arith.addi %arg1, %c1_i32_5 : i32
    %c4_i32 = arith.constant 4 : i32
    %14 = arith.cmpi slt, %13, %c4_i32 : i32
    %15 = arith.extui %14 : i1 to i32
    %c0_i32_6 = arith.constant 0 : i32
    %16 = arith.cmpi ne, %15, %c0_i32_6 : i32
    scf.if %16 {
      %c1_i32_86 = arith.constant 1 : i32
      %146 = arith.addi %arg1, %c1_i32_86 : i32
      %c1_i32_87 = arith.constant 1 : i32
      %147 = arith.subi %c1_i32_87, %9 : i32
      %c64_i32_88 = arith.constant 64 : i32
      %148 = arith.muli %146, %c64_i32_88 : i32
      %c0_i32_89 = arith.constant 0 : i32
      %149 = tpu.memref_slice %arg2[%arg0, %148, %c0_i32_89] : memref<2x288x256xbf16, #tpu.memory_space<any>> -> memref<1x96x256xbf16, #tpu.memory_space<any>>
      %150 = tpu.memref_squeeze %149 : memref<1x96x256xbf16, #tpu.memory_space<any>> -> memref<96x256xbf16, #tpu.memory_space<any>>
      %c0_i32_90 = arith.constant 0 : i32
      %c0_i32_91 = arith.constant 0 : i32
      %151 = tpu.memref_slice %arg10[%147, %c0_i32_90, %c0_i32_91] : memref<2x96x256xbf16, #tpu.memory_space<vmem>> -> memref<1x96x256xbf16, #tpu.memory_space<vmem>>
      %152 = tpu.memref_squeeze %151 : memref<1x96x256xbf16, #tpu.memory_space<vmem>> -> memref<96x256xbf16, #tpu.memory_space<vmem>>
      %153 = tpu.memref_slice %arg12[%147] : memref<2x!tpu.dma_semaphore, #tpu.memory_space<semaphore_mem>> -> memref<1x!tpu.dma_semaphore, #tpu.memory_space<semaphore_mem>>
      %154 = tpu.memref_squeeze %153 : memref<1x!tpu.dma_semaphore, #tpu.memory_space<semaphore_mem>> -> memref<!tpu.dma_semaphore, #tpu.memory_space<semaphore_mem>>
      tpu.enqueue_dma source(%150 : memref<96x256xbf16, #tpu.memory_space<any>>) target(%152 : memref<96x256xbf16, #tpu.memory_space<vmem>>) target_semaphore(%154 : memref<!tpu.dma_semaphore, #tpu.memory_space<semaphore_mem>>)
    } else {
    }
    %c64_i32 = arith.constant 64 : i32
    %17 = arith.muli %arg1, %c64_i32 : i32
    %c0_i32_7 = arith.constant 0 : i32
    %18 = tpu.memref_slice %arg2[%arg0, %17, %c0_i32_7] : memref<2x288x256xbf16, #tpu.memory_space<any>> -> memref<1x96x256xbf16, #tpu.memory_space<any>>
    %19 = tpu.memref_squeeze %18 : memref<1x96x256xbf16, #tpu.memory_space<any>> -> memref<96x256xbf16, #tpu.memory_space<any>>
    %c0_i32_8 = arith.constant 0 : i32
    %c0_i32_9 = arith.constant 0 : i32
    %20 = tpu.memref_slice %arg10[%9, %c0_i32_8, %c0_i32_9] : memref<2x96x256xbf16, #tpu.memory_space<vmem>> -> memref<1x96x256xbf16, #tpu.memory_space<vmem>>
    %21 = tpu.memref_squeeze %20 : memref<1x96x256xbf16, #tpu.memory_space<vmem>> -> memref<96x256xbf16, #tpu.memory_space<vmem>>
    %22 = tpu.memref_slice %arg12[%9] : memref<2x!tpu.dma_semaphore, #tpu.memory_space<semaphore_mem>> -> memref<1x!tpu.dma_semaphore, #tpu.memory_space<semaphore_mem>>
    %23 = tpu.memref_squeeze %22 : memref<1x!tpu.dma_semaphore, #tpu.memory_space<semaphore_mem>> -> memref<!tpu.dma_semaphore, #tpu.memory_space<semaphore_mem>>
    tpu.wait_dma2 semaphore(%23 : memref<!tpu.dma_semaphore, #tpu.memory_space<semaphore_mem>>) src(%19 : memref<96x256xbf16, #tpu.memory_space<any>>) dst(%21 : memref<96x256xbf16, #tpu.memory_space<vmem>>)
    %24 = arith.index_cast %9 : i32 to index
    %c0 = arith.constant 0 : index
    %c0_10 = arith.constant 0 : index
    %25 = vector.load %arg10[%24, %c0, %c0_10] : memref<2x96x256xbf16, #tpu.memory_space<vmem>>, vector<1x96x256xbf16>
    %26 = vector.shape_cast %25 : vector<1x96x256xbf16> to vector<96x256xbf16>
    %c0_11 = arith.constant 0 : index
    %c0_12 = arith.constant 0 : index
    %27 = vector.load %arg3[%c0_11, %c0_12] : memref<256x128xbf16, #tpu.memory_space<vmem>>, vector<256x128xbf16>
    %cst = arith.constant dense<0.000000e+00> : vector<96x128xf32>
    %28 = tpu.matmul %26, %27, %cst {dimension_numbers = #tpu.dot_dimension_numbers<[1], [0], [0], [1], [0, 0, 1, 1], [], []>} : vector<96x256xbf16>, vector<256x128xbf16>, vector<96x128xf32> -> vector<96x128xf32>
    %c0_13 = arith.constant 0 : index
    %c0_14 = arith.constant 0 : index
    %29 = vector.load %arg4[%c0_13, %c0_14] : memref<1x128xf32, #tpu.memory_space<vmem>>, vector<1x128xf32>
    %30 = vector.broadcast %29 : vector<1x128xf32> to vector<96x128xf32>
    %31 = arith.addf %28, %30 : vector<96x128xf32>
    %cst_15 = arith.constant 0.000000e+00 : f32
    %32 = vector.broadcast %cst_15 : f32 to vector<96x128xf32>
    %33 = arith.maximumf %31, %32 : vector<96x128xf32>
    %34 = arith.truncf %33 : vector<96x128xf32> to vector<96x128xbf16>
    %c8 = arith.constant 8 : index
    %c0_16 = arith.constant 0 : index
    %35 = vector.load %arg11[%c8, %c0_16] : memref<112x128xbf16, #tpu.memory_space<vmem>>, vector<96x128xbf16>
    tpu.vector_store %arg11[%c8, %c0_16], %34 {strides = array<i32>} : memref<112x128xbf16, #tpu.memory_space<vmem>>, vector<96x128xbf16>,
    %cst_17 = arith.constant 0.000000e+00 : bf16
    %36 = vector.broadcast %cst_17 : bf16 to vector<8x128xbf16>
    %c0_18 = arith.constant 0 : index
    %c0_19 = arith.constant 0 : index
    %37 = vector.load %arg11[%c0_18, %c0_19] : memref<112x128xbf16, #tpu.memory_space<vmem>>, vector<8x128xbf16>
    tpu.vector_store %arg11[%c0_18, %c0_19], %36 {strides = array<i32>} : memref<112x128xbf16, #tpu.memory_space<vmem>>, vector<8x128xbf16>,
    %c104 = arith.constant 104 : index
    %c0_20 = arith.constant 0 : index
    %38 = vector.load %arg11[%c104, %c0_20] : memref<112x128xbf16, #tpu.memory_space<vmem>>, vector<8x128xbf16>
    tpu.vector_store %arg11[%c104, %c0_20], %36 {strides = array<i32>} : memref<112x128xbf16, #tpu.memory_space<vmem>>, vector<8x128xbf16>,
    %c0_i32_21 = arith.constant 0 : i32
    %39 = arith.cmpi eq, %arg1, %c0_i32_21 : i32
    %40 = arith.extui %39 : i1 to i32
    %c0_i32_22 = arith.constant 0 : i32
    %41 = arith.cmpi ne, %40, %c0_i32_22 : i32
    scf.if %41 {
      %cst_86 = arith.constant 0.000000e+00 : bf16
      %146 = vector.broadcast %cst_86 : bf16 to vector<16x128xbf16>
      %c8_87 = arith.constant 8 : index
      %c0_88 = arith.constant 0 : index
      %147 = vector.load %arg11[%c8_87, %c0_88] : memref<112x128xbf16, #tpu.memory_space<vmem>>, vector<16x128xbf16>
      tpu.vector_store %arg11[%c8_87, %c0_88], %146 {strides = array<i32>} : memref<112x128xbf16, #tpu.memory_space<vmem>>, vector<16x128xbf16>,
    } else {
    }
    %c3_i32 = arith.constant 3 : i32
    %42 = arith.cmpi eq, %arg1, %c3_i32 : i32
    %43 = arith.extui %42 : i1 to i32
    %c0_i32_23 = arith.constant 0 : i32
    %44 = arith.cmpi ne, %43, %c0_i32_23 : i32
    scf.if %44 {
      %cst_86 = arith.constant 0.000000e+00 : bf16
      %146 = vector.broadcast %cst_86 : bf16 to vector<16x128xbf16>
      %c88 = arith.constant 88 : index
      %c0_87 = arith.constant 0 : index
      %147 = vector.load %arg11[%c88, %c0_87] : memref<112x128xbf16, #tpu.memory_space<vmem>>, vector<16x128xbf16>
      tpu.vector_store %arg11[%c88, %c0_87], %146 {strides = array<i32>} : memref<112x128xbf16, #tpu.memory_space<vmem>>, vector<16x128xbf16>,
    } else {
    }
    %45 = tpu.iota {dimensions = array<i32: 0>} : vector<64x1xi32>
    %c16_i32 = arith.constant 16 : i32
    %c0_i32_24 = arith.constant 0 : i32
    %46 = arith.cmpi eq, %c16_i32, %c0_i32_24 : i32
    %c1_i32_25 = arith.constant 1 : i32
    %47 = arith.select %46, %c1_i32_25, %c16_i32 : i32
    %48 = vector.broadcast %47 : i32 to vector<64x1xi32>
    %49 = arith.remsi %45, %48 : vector<64x1xi32>
    %c0_i32_26 = arith.constant 0 : i32
    %50 = vector.broadcast %c0_i32_26 : i32 to vector<64x1xi32>
    %51 = arith.cmpi ne, %49, %50 : vector<64x1xi32>
    %c0_i32_27 = arith.constant 0 : i32
    %52 = vector.broadcast %c0_i32_27 : i32 to vector<64x1xi32>
    %53 = arith.cmpi slt, %49, %52 : vector<64x1xi32>
    %c0_i32_28 = arith.constant 0 : i32
    %54 = arith.cmpi slt, %47, %c0_i32_28 : i32
    %55 = vector.broadcast %54 : i1 to vector<64x1xi1>
    %56 = vector.broadcast %55 : vector<64x1xi1> to vector<64x1xi1>
    %57 = arith.xori %53, %56 : vector<64x1xi1>
    %58 = arith.andi %57, %51 : vector<64x1xi1>
    %59 = vector.broadcast %47 : i32 to vector<64x1xi32>
    %60 = arith.addi %49, %59 : vector<64x1xi32>
    %61 = arith.select %58, %60, %49 : vector<64x1xi1>, vector<64x1xi32>
    %c0_i32_29 = arith.constant 0 : i32
    %62 = vector.broadcast %c0_i32_29 : i32 to vector<64x1xi32>
    %63 = arith.cmpi ne, %61, %62 : vector<64x1xi32>
    %64 = arith.extui %63 : vector<64x1xi1> to vector<64x1xi32>
    %65 = arith.sitofp %64 : vector<64x1xi32> to vector<64x1xf32>
    %c15_i32 = arith.constant 15 : i32
    %66 = vector.broadcast %c15_i32 : i32 to vector<64x1xi32>
    %67 = arith.cmpi ne, %61, %66 : vector<64x1xi32>
    %68 = arith.extui %67 : vector<64x1xi1> to vector<64x1xi32>
    %69 = arith.sitofp %68 : vector<64x1xi32> to vector<64x1xf32>
    %cst_30 = arith.constant 0.000000e+00 : f32
    %70 = vector.broadcast %cst_30 : f32 to vector<64x128xf32>
    %cst_31 = arith.constant 0.000000e+00 : f32
    %71 = vector.broadcast %cst_31 : f32 to vector<64x128xf32>
    %c7 = arith.constant 7 : index
    %c0_32 = arith.constant 0 : index
    %72 = vector.load %arg11[%c7, %c0_32] : memref<112x128xbf16, #tpu.memory_space<vmem>>, vector<64x128xbf16>
    %c0_33 = arith.constant 0 : index
    %c0_34 = arith.constant 0 : index
    %c0_35 = arith.constant 0 : index
    %73 = vector.load %arg5[%c0_33, %c0_34, %c0_35] : memref<9x128x128xbf16, #tpu.memory_space<vmem>>, vector<1x128x128xbf16>
    %74 = vector.shape_cast %73 : vector<1x128x128xbf16> to vector<128x128xbf16>
    %cst_36 = arith.constant dense<0.000000e+00> : vector<64x128xf32>
    %75 = tpu.matmul %72, %74, %cst_36 {dimension_numbers = #tpu.dot_dimension_numbers<[1], [0], [0], [1], [0, 0, 1, 1], [], []>} : vector<64x128xbf16>, vector<128x128xbf16>, vector<64x128xf32> -> vector<64x128xf32>
    %76 = arith.addf %71, %75 : vector<64x128xf32>
    %c23 = arith.constant 23 : index
    %c0_37 = arith.constant 0 : index
    %77 = vector.load %arg11[%c23, %c0_37] : memref<112x128xbf16, #tpu.memory_space<vmem>>, vector<64x128xbf16>
    %c3 = arith.constant 3 : index
    %c0_38 = arith.constant 0 : index
    %c0_39 = arith.constant 0 : index
    %78 = vector.load %arg5[%c3, %c0_38, %c0_39] : memref<9x128x128xbf16, #tpu.memory_space<vmem>>, vector<1x128x128xbf16>
    %79 = vector.shape_cast %78 : vector<1x128x128xbf16> to vector<128x128xbf16>
    %cst_40 = arith.constant dense<0.000000e+00> : vector<64x128xf32>
    %80 = tpu.matmul %77, %79, %cst_40 {dimension_numbers = #tpu.dot_dimension_numbers<[1], [0], [0], [1], [0, 0, 1, 1], [], []>} : vector<64x128xbf16>, vector<128x128xbf16>, vector<64x128xf32> -> vector<64x128xf32>
    %81 = arith.addf %76, %80 : vector<64x128xf32>
    %c39 = arith.constant 39 : index
    %c0_41 = arith.constant 0 : index
    %82 = vector.load %arg11[%c39, %c0_41] : memref<112x128xbf16, #tpu.memory_space<vmem>>, vector<64x128xbf16>
    %c6 = arith.constant 6 : index
    %c0_42 = arith.constant 0 : index
    %c0_43 = arith.constant 0 : index
    %83 = vector.load %arg5[%c6, %c0_42, %c0_43] : memref<9x128x128xbf16, #tpu.memory_space<vmem>>, vector<1x128x128xbf16>
    %84 = vector.shape_cast %83 : vector<1x128x128xbf16> to vector<128x128xbf16>
    %cst_44 = arith.constant dense<0.000000e+00> : vector<64x128xf32>
    %85 = tpu.matmul %82, %84, %cst_44 {dimension_numbers = #tpu.dot_dimension_numbers<[1], [0], [0], [1], [0, 0, 1, 1], [], []>} : vector<64x128xbf16>, vector<128x128xbf16>, vector<64x128xf32> -> vector<64x128xf32>
    %86 = arith.addf %81, %85 : vector<64x128xf32>
    %87 = vector.broadcast %65 : vector<64x1xf32> to vector<64x128xf32>
    %88 = arith.mulf %86, %87 : vector<64x128xf32>
    %89 = arith.addf %70, %88 : vector<64x128xf32>
    %cst_45 = arith.constant 0.000000e+00 : f32
    %90 = vector.broadcast %cst_45 : f32 to vector<64x128xf32>
    %c8_46 = arith.constant 8 : index
    %c0_47 = arith.constant 0 : index
    %91 = vector.load %arg11[%c8_46, %c0_47] : memref<112x128xbf16, #tpu.memory_space<vmem>>, vector<64x128xbf16>
    %c1 = arith.constant 1 : index
    %c0_48 = arith.constant 0 : index
    %c0_49 = arith.constant 0 : index
    %92 = vector.load %arg5[%c1, %c0_48, %c0_49] : memref<9x128x128xbf16, #tpu.memory_space<vmem>>, vector<1x128x128xbf16>
    %93 = vector.shape_cast %92 : vector<1x128x128xbf16> to vector<128x128xbf16>
    %cst_50 = arith.constant dense<0.000000e+00> : vector<64x128xf32>
    %94 = tpu.matmul %91, %93, %cst_50 {dimension_numbers = #tpu.dot_dimension_numbers<[1], [0], [0], [1], [0, 0, 1, 1], [], []>} : vector<64x128xbf16>, vector<128x128xbf16>, vector<64x128xf32> -> vector<64x128xf32>
    %95 = arith.addf %90, %94 : vector<64x128xf32>
    %c24 = arith.constant 24 : index
    %c0_51 = arith.constant 0 : index
    %96 = vector.load %arg11[%c24, %c0_51] : memref<112x128xbf16, #tpu.memory_space<vmem>>, vector<64x128xbf16>
    %c4 = arith.constant 4 : index
    %c0_52 = arith.constant 0 : index
    %c0_53 = arith.constant 0 : index
    %97 = vector.load %arg5[%c4, %c0_52, %c0_53] : memref<9x128x128xbf16, #tpu.memory_space<vmem>>, vector<1x128x128xbf16>
    %98 = vector.shape_cast %97 : vector<1x128x128xbf16> to vector<128x128xbf16>
    %cst_54 = arith.constant dense<0.000000e+00> : vector<64x128xf32>
    %99 = tpu.matmul %96, %98, %cst_54 {dimension_numbers = #tpu.dot_dimension_numbers<[1], [0], [0], [1], [0, 0, 1, 1], [], []>} : vector<64x128xbf16>, vector<128x128xbf16>, vector<64x128xf32> -> vector<64x128xf32>
    %100 = arith.addf %95, %99 : vector<64x128xf32>
    %c40 = arith.constant 40 : index
    %c0_55 = arith.constant 0 : index
    %101 = vector.load %arg11[%c40, %c0_55] : memref<112x128xbf16, #tpu.memory_space<vmem>>, vector<64x128xbf16>
    %c7_56 = arith.constant 7 : index
    %c0_57 = arith.constant 0 : index
    %c0_58 = arith.constant 0 : index
    %102 = vector.load %arg5[%c7_56, %c0_57, %c0_58] : memref<9x128x128xbf16, #tpu.memory_space<vmem>>, vector<1x128x128xbf16>
    %103 = vector.shape_cast %102 : vector<1x128x128xbf16> to vector<128x128xbf16>
    %cst_59 = arith.constant dense<0.000000e+00> : vector<64x128xf32>
    %104 = tpu.matmul %101, %103, %cst_59 {dimension_numbers = #tpu.dot_dimension_numbers<[1], [0], [0], [1], [0, 0, 1, 1], [], []>} : vector<64x128xbf16>, vector<128x128xbf16>, vector<64x128xf32> -> vector<64x128xf32>
    %105 = arith.addf %100, %104 : vector<64x128xf32>
    %106 = arith.addf %89, %105 : vector<64x128xf32>
    %cst_60 = arith.constant 0.000000e+00 : f32
    %107 = vector.broadcast %cst_60 : f32 to vector<64x128xf32>
    %c9 = arith.constant 9 : index
    %c0_61 = arith.constant 0 : index
    %108 = vector.load %arg11[%c9, %c0_61] : memref<112x128xbf16, #tpu.memory_space<vmem>>, vector<64x128xbf16>
    %c2 = arith.constant 2 : index
    %c0_62 = arith.constant 0 : index
    %c0_63 = arith.constant 0 : index
    %109 = vector.load %arg5[%c2, %c0_62, %c0_63] : memref<9x128x128xbf16, #tpu.memory_space<vmem>>, vector<1x128x128xbf16>
    %110 = vector.shape_cast %109 : vector<1x128x128xbf16> to vector<128x128xbf16>
    %cst_64 = arith.constant dense<0.000000e+00> : vector<64x128xf32>
    %111 = tpu.matmul %108, %110, %cst_64 {dimension_numbers = #tpu.dot_dimension_numbers<[1], [0], [0], [1], [0, 0, 1, 1], [], []>} : vector<64x128xbf16>, vector<128x128xbf16>, vector<64x128xf32> -> vector<64x128xf32>
    %112 = arith.addf %107, %111 : vector<64x128xf32>
    %c25 = arith.constant 25 : index
    %c0_65 = arith.constant 0 : index
    %113 = vector.load %arg11[%c25, %c0_65] : memref<112x128xbf16, #tpu.memory_space<vmem>>, vector<64x128xbf16>
    %c5 = arith.constant 5 : index
    %c0_66 = arith.constant 0 : index
    %c0_67 = arith.constant 0 : index
    %114 = vector.load %arg5[%c5, %c0_66, %c0_67] : memref<9x128x128xbf16, #tpu.memory_space<vmem>>, vector<1x128x128xbf16>
    %115 = vector.shape_cast %114 : vector<1x128x128xbf16> to vector<128x128xbf16>
    %cst_68 = arith.constant dense<0.000000e+00> : vector<64x128xf32>
    %116 = tpu.matmul %113, %115, %cst_68 {dimension_numbers = #tpu.dot_dimension_numbers<[1], [0], [0], [1], [0, 0, 1, 1], [], []>} : vector<64x128xbf16>, vector<128x128xbf16>, vector<64x128xf32> -> vector<64x128xf32>
    %117 = arith.addf %112, %116 : vector<64x128xf32>
    %c41 = arith.constant 41 : index
    %c0_69 = arith.constant 0 : index
    %118 = vector.load %arg11[%c41, %c0_69] : memref<112x128xbf16, #tpu.memory_space<vmem>>, vector<64x128xbf16>
    %c8_70 = arith.constant 8 : index
    %c0_71 = arith.constant 0 : index
    %c0_72 = arith.constant 0 : index
    %119 = vector.load %arg5[%c8_70, %c0_71, %c0_72] : memref<9x128x128xbf16, #tpu.memory_space<vmem>>, vector<1x128x128xbf16>
    %120 = vector.shape_cast %119 : vector<1x128x128xbf16> to vector<128x128xbf16>
    %cst_73 = arith.constant dense<0.000000e+00> : vector<64x128xf32>
    %121 = tpu.matmul %118, %120, %cst_73 {dimension_numbers = #tpu.dot_dimension_numbers<[1], [0], [0], [1], [0, 0, 1, 1], [], []>} : vector<64x128xbf16>, vector<128x128xbf16>, vector<64x128xf32> -> vector<64x128xf32>
    %122 = arith.addf %117, %121 : vector<64x128xf32>
    %123 = vector.broadcast %69 : vector<64x1xf32> to vector<64x128xf32>
    %124 = arith.mulf %122, %123 : vector<64x128xf32>
    %125 = arith.addf %106, %124 : vector<64x128xf32>
    %c0_74 = arith.constant 0 : index
    %c0_75 = arith.constant 0 : index
    %126 = vector.load %arg6[%c0_74, %c0_75] : memref<1x128xf32, #tpu.memory_space<vmem>>, vector<1x128xf32>
    %127 = vector.broadcast %126 : vector<1x128xf32> to vector<64x128xf32>
    %128 = arith.addf %125, %127 : vector<64x128xf32>
    %cst_76 = arith.constant 0.000000e+00 : f32
    %129 = vector.broadcast %cst_76 : f32 to vector<64x128xf32>
    %130 = arith.maximumf %128, %129 : vector<64x128xf32>
    %131 = arith.truncf %130 : vector<64x128xf32> to vector<64x128xbf16>
    %c0_77 = arith.constant 0 : index
    %c0_78 = arith.constant 0 : index
    %132 = vector.load %arg7[%c0_77, %c0_78] : memref<128x256xbf16, #tpu.memory_space<vmem>>, vector<128x256xbf16>
    %cst_79 = arith.constant dense<0.000000e+00> : vector<64x256xf32>
    %133 = tpu.matmul %131, %132, %cst_79 {dimension_numbers = #tpu.dot_dimension_numbers<[1], [0], [0], [1], [0, 0, 1, 1], [], []>} : vector<64x128xbf16>, vector<128x256xbf16>, vector<64x256xf32> -> vector<64x256xf32>
    %134 = vector.extract_strided_slice %26 {offsets = [16, 0], sizes = [64, 256], strides = [1, 1]} : vector<96x256xbf16> to vector<64x256xbf16>
    %135 = arith.extf %134 : vector<64x256xbf16> to vector<64x256xf32>
    %c0_80 = arith.constant 0 : index
    %c0_81 = arith.constant 0 : index
    %136 = vector.load %arg8[%c0_80, %c0_81] : memref<1x256xf32, #tpu.memory_space<vmem>>, vector<1x256xf32>
    %137 = vector.broadcast %136 : vector<1x256xf32> to vector<64x256xf32>
    %138 = arith.addf %133, %137 : vector<64x256xf32>
    %139 = arith.addf %138, %135 : vector<64x256xf32>
    %cst_82 = arith.constant 0.000000e+00 : f32
    %140 = vector.broadcast %cst_82 : f32 to vector<64x256xf32>
    %141 = arith.maximumf %139, %140 : vector<64x256xf32>
    %142 = arith.truncf %141 : vector<64x256xf32> to vector<64x256xbf16>
    %c0_83 = arith.constant 0 : index
    %c0_84 = arith.constant 0 : index
    %c0_85 = arith.constant 0 : index
    %143 = vector.load %arg9[%c0_83, %c0_84, %c0_85] : memref<1x64x256xbf16, #tpu.memory_space<vmem>>, vector<1x64x256xbf16>
    %144 = vector.shape_cast %143 : vector<1x64x256xbf16> to vector<64x256xbf16>
    %145 = vector.shape_cast %142 : vector<64x256xbf16> to vector<1x64x256xbf16>
    tpu.vector_store %arg9[%c0_83, %c0_84, %c0_85], %145 {strides = array<i32>} : memref<1x64x256xbf16, #tpu.memory_space<vmem>>, vector<1x64x256xbf16>,
    return
  }
  func.func @transform_1(%arg0: i32, %arg1: i32) -> (i32, i32) {
    %c0_i32 = arith.constant 0 : i32
    %c0_i32_0 = arith.constant 0 : i32
    %c0_i32_1 = arith.constant 0 : i32
    return %c0_i32, %c0_i32_0 : i32, i32
  }
  func.func @transform_2(%arg0: i32, %arg1: i32) -> (i32, i32) {
    %c0_i32 = arith.constant 0 : i32
    %c0_i32_0 = arith.constant 0 : i32
    %c0_i32_1 = arith.constant 0 : i32
    return %c0_i32, %c0_i32_0 : i32, i32
  }
  func.func @transform_3(%arg0: i32, %arg1: i32) -> (i32, i32, i32) {
    %c0_i32 = arith.constant 0 : i32
    %c0_i32_0 = arith.constant 0 : i32
    %c0_i32_1 = arith.constant 0 : i32
    %c0_i32_2 = arith.constant 0 : i32
    return %c0_i32, %c0_i32_0, %c0_i32_1 : i32, i32, i32
  }
  func.func @transform_4(%arg0: i32, %arg1: i32) -> (i32, i32) {
    %c0_i32 = arith.constant 0 : i32
    %c0_i32_0 = arith.constant 0 : i32
    %c0_i32_1 = arith.constant 0 : i32
    return %c0_i32, %c0_i32_0 : i32, i32
  }
  func.func @transform_5(%arg0: i32, %arg1: i32) -> (i32, i32) {
    %c0_i32 = arith.constant 0 : i32
    %c0_i32_0 = arith.constant 0 : i32
    %c0_i32_1 = arith.constant 0 : i32
    return %c0_i32, %c0_i32_0 : i32, i32
  }
  func.func @transform_6(%arg0: i32, %arg1: i32) -> (i32, i32) {
    %c0_i32 = arith.constant 0 : i32
    %c0_i32_0 = arith.constant 0 : i32
    %c0_i32_1 = arith.constant 0 : i32
    return %c0_i32, %c0_i32_0 : i32, i32
  }
  func.func @transform_7(%arg0: i32, %arg1: i32) -> (i32, i32, i32) {
    %c0_i32 = arith.constant 0 : i32
    %c0_i32_0 = arith.constant 0 : i32
    return %arg0, %arg1, %c0_i32 : i32, i32, i32
  }
}

</mosaic_0001>

<bundles_post_ra>
// kernel: tpu_custom_call.1
= control target key start
LH: loop header
LB: loop body
LE: loop exit
PB: predicated region body
PF: predicated region fallthrough
CT: control target
= control target key end

     0   :  { %12 = vsyncpa [#allocation6], 0  ;;  %s4534_s0 = inlined_call_operand.hbm [shape: bf16[2,288,256], index: 0, kind: input, shape index: {}]   ;;  %s4535_s1 = inlined_call_operand.hbm [shape: bf16[256,128], index: 1, kind: input, shape index: {}]   ;;  %s4536_s2 = inlined_call_operand.vmem [shape: f32[1,128], index: 2, kind: input, shape index: {}]   ;;  %s4537_s3 = inlined_call_operand.hbm [shape: bf16[9,128,128], index: 3, kind: input, shape index: {}]   ;;  %s4538_s4 = inlined_call_operand.vmem [shape: f32[1,128], index: 4, kind: input, shape index: {}]   ;;  %s4539_s5 = inlined_call_operand.hbm [shape: bf16[128,256], index: 5, kind: input, shape index: {}]   ;;  %s4540_s6 = inlined_call_operand.vmem [shape: f32[1,256], index: 6, kind: input, shape index: {}]   ;;  %s4541_s7 = inlined_call_operand.hbm [shape: bf16[2,256,256], index: 7, kind: output, shape index: {}]  }
   0x1   :  { %13 = vsyncpa [#allocation9], 0 }
   0x2   :  { %14 = vsyncpa [#allocation7], 0 }
   0x3   :  { %16 = vsyncpa [#allocation7 + $0x1], 0  ;;  %s3938_s24 = smov 0   ;;  %s3940_s25 = smov 0  }
   0x4   :  { %s3942_s26 = smov 0   ;;  %s3944_s27 = smov 0  }
   0x5   :  { %s3946_s28 = smov 0   ;;  %s3948_s29 = smov 0  }
   0x6   :  { %s3950_s30 = smov 0   ;;  %s3952_s8 = smov 0  }
   0x7 LB: > { %4554 = sst [smem:[#allocation22_spill]] %s3840_s24  ;;  %s2819_s9 = sadd.s32 4294967295, %s3868_s8   ;;  %s3868_s8 = sphi %s3952_s8, %s22_s8   ;;  %s3864_s30 = sphi %s3950_s30, %s4581_s30   ;;  %s3860_s29 = sphi %s3948_s29, %s4580_s29   ;;  %s3856_s28 = sphi %s3946_s28, %s4579_s28   ;;  %s3852_s27 = sphi %s3944_s27, %s4578_s27   ;;  %s3848_s26 = sphi %s3942_s26, %s4577_s26   ;;  %s3844_s25 = sphi %s3940_s25, %s4583_s25   ;;  %s3840_s24 = sphi %s3938_s24, %s4582_s24  }
   0x8   : > { %4555 = sst [smem:[#allocation23_spill]] %s3848_s26  ;;  %s2820_s10 = sadd.s32 4294967294, %s3868_s8  }
   0x9   : > { %4556 = sst [smem:[#allocation24_spill]] %s3860_s29  ;;  %s31_s11 = sadd.s32 1, %s3860_s29 }
   0xa   : > { %4557 = sst [smem:[#allocation25_spill]] %s3864_s30  ;;  %s34_s12 = sadd.s32 1, %s3864_s30 }
   0xb   : > { %p32_p0 = scmp.ge.s32.totalorder %s31_s11, 4  ;;  %s169_s13 = sadd.s32 1, %s3848_s26 }
   0xc   : > { %p179_p1 = scmp.ne.s32.totalorder %s3848_s26, %s3844_s25  ;;  %p180_p2 = scmp.eq.s32.totalorder %s2819_s9, 7 }
   0xd   : > { %s4585_s11 = smov (%p32_p0, %s31_s11), 0  ;;  %s4587_s12 = smov (!%p32_p0, %s34_s12), %s3864_s30 }
   0xe   : > { %4558 = sst [smem:[#allocation26_spill]] %s4585_s11  ;;  %s165_s14 = ssub.s32 %s3860_s29, %s4585_s11 }
   0xf   : > { %p3990_p3 = por %p180_p2, %p179_p1  ;;  %p36_p4 = scmp.ge.s32.totalorder %s4587_s12, 2 }
  0x10   : > { %p185_p5 = scmp.ne.s32.totalorder %s3844_s25, %s3840_s24  ;;  %p186_p6 = scmp.eq.s32.totalorder %s2820_s10, 7 }
  0x11   : > { %s4559_s15 = scalar_select %p3990_p3, 1, 0 }
  0x12   : > { %p2821_p7 = scmp.ge.s32.totalorder %s3868_s8, 1  ;;  %s4589_s12 = smov (%p36_p4, %s4587_s12), 0 }
  0x13   : > { %4560 = sst [smem:[#allocation27_spill]] %s4589_s12  ;;  %p3999_p8 = por %p186_p6, %p185_p5 }
  0x14   : > { %p193_p9 = scmp.lt.s32.totalorder %s3868_s8, 9  ;;  %s164_s17 = ssub.s32 %s3864_s30, %s4589_s12 }
  0x15   : > { %s4561_s16 = scalar_select %p3999_p8, 1, 0 }
  0x16   : > { %s166_s18 = sor.u32 %s165_s14, %s164_s17  ;;  %p4006_p10 = pnand %p2821_p7, %p193_p9 }
  0x17   : > { %4562 = sst [smem:[#allocation28_spill]] %s4561_s16  ;;  %p167_p11 = scmp.eq.s32.totalorder %s166_s18, 0 }
  0x18   : > { %s4563_s19 = scalar_select %p4006_p10, 1, 0 }
  0x19   : > { %p4010_p12 = scmp.eq.s32.totalorder %s2819_s9, 0  ;;  %p3454_p13 = pneg %p4006_p10 }
  0x1a   : > { %s4017_s21 = scalar_select %p167_p11, %s3848_s26, %s169_s13  }
  0x1b   : > { %s4564_s20 = scalar_select %p4010_p12, 1, 0 }
  0x1c   : > { %4565 = sst [smem:[#allocation29_spill]] %s4017_s21  ;;  %p4021_p0 = pnand %p4010_p12, %p3454_p13 }
  0x1d   : > { %s3870_s23 = smov [#allocation8]   ;;  %s3680_s9 = scalar_lea.hbm %s4537_s3, 9216 }
  0x1e   : > { %s221_s10 = sshll.u32 %s3870_s23, 4  ;;  %p3681_p1 = scmp.ne.s32.totalorder %s4537_s3, %s3680_s9  ;;  %s222_s10 = int_to_ptr.vmem [resolvable:$true] %s221_s10 }
  0x1f   : > { %p4033_p2 = pneg %p4021_p0  ;;  %p3687_p6 = scmp.lt.u32.totalorder %s3680_s9, %s4537_s3 }
  0x21   : > { %p3683_p4 = pnand %p4033_p2, %p3681_p1 }
  0x23   : > { %p3684_p5 = pneg %p3683_p4 }
  0x25   : > { %p3689_p7 = pnand %p3687_p6, %p3684_p5 }
  0x27   : > { %3692 = shalt.err (!%p3689_p7)
}
  0x28   : > { %s3693_s14 = scalar_lea.vmem %s222_s10, 9216  ;;  %p3701_p8 = scmp.lt.s32.totalorder %s222_s10, %s222_s10 }
  0x29   : > { %p3694_p9 = scmp.ne.s32.totalorder %s222_s10, %s3693_s14  ;;  %p3702_p3 = scmp.lt.s32.totalorder %s3693_s14, %s3693_s14 }
  0x2b   : > { %p3696_p11 = pnand %p3694_p9, %p4033_p2  ;;  %p3703_p12 = por %p3702_p3, %p3701_p8 }
  0x2d   : > { %p3697_p13 = pneg %p3696_p11 }
  0x2f   : > { %p3704_p10 = pnand %p3703_p12, %p3697_p13 }
  0x31   : > { %3707 = shalt.err (!%p3704_p10)
}
  0x32   : > { %s3871_s12 = smov 64   ;;  %s3872_s17 = smov 4  }
  0x33   : > { %3460 = dma.hbm_to_vmem [thread:$0]  (!%p4021_p0), %s4537_s3, 9216, %s222_s10, [#allocation9], %s3871_s12, %s3871_s12, %s3872_s17  }
  0x34   : > { %s3873_s18 = smov [#allocation5]   ;;  %s3874_s30 = smov [#allocation10]  }
  0x35   : > { %s205_s23 = sshll.u32 %s3873_s18, 4  ;;  %s237_s29 = sshll.u32 %s3874_s30, 4  ;;  %s206_s23 = int_to_ptr.vmem [resolvable:$true] %s205_s23  ;;  %s4049_s29 = int_to_ptr.vmem [resolvable:$true] %s237_s29 }
  0x36   : > { %s3708_s26 = scalar_lea.hbm %s4535_s1, 2048 }
  0x37   : > { %p3709_p3 = scmp.ne.s32.totalorder %s4535_s1, %s3708_s26  ;;  %p3715_p12 = scmp.lt.u32.totalorder %s3708_s26, %s4535_s1 }
  0x39   : > { %p3711_p8 = pnand %p3709_p3, %p4033_p2 }
  0x3b   : > { %p3712_p10 = pneg %p3711_p8 }
  0x3d   : > { %p3717_p1 = pnand %p3715_p12, %p3712_p10 }
  0x3f   : > { %3720 = shalt.err (!%p3717_p1)
}
  0x40   : > { %s3721_s30 = scalar_lea.vmem %s206_s23, 2048  ;;  %p3729_p7 = scmp.lt.s32.totalorder %s206_s23, %s206_s23 }
  0x41   : > { %p3722_p4 = scmp.ne.s32.totalorder %s206_s23, %s3721_s30  ;;  %p3730_p9 = scmp.lt.s32.totalorder %s3721_s30, %s3721_s30 }
  0x43   : > { %p3724_p5 = pnand %p3722_p4, %p4033_p2  ;;  %p3731_p11 = por %p3730_p9, %p3729_p7 }
  0x45   : > { %p3725_p6 = pneg %p3724_p5 }
  0x47   : > { %p3732_p13 = pnand %p3731_p11, %p3725_p6 }
  0x49   : > { %3735 = shalt.err (!%p3732_p13)
}
  0x4a   : > { %3457 = dma.hbm_to_vmem [thread:$0]  (!%p4021_p0), %s4535_s1, 2048, %s206_s23, [#allocation6], %s3871_s12, %s3871_s12, %s3872_s17  }
  0x4b   : > { %s3736_s9 = scalar_lea.hbm %s4539_s5, 2048 }
  0x4c   : > { %p3737_p3 = scmp.ne.s32.totalorder %s4539_s5, %s3736_s9  ;;  %p3743_p12 = scmp.lt.u32.totalorder %s3736_s9, %s4539_s5 }
  0x4e   : > { %p3739_p8 = pnand %p3737_p3, %p4033_p2 }
  0x50   : > { %p3740_p10 = pneg %p3739_p8 }
  0x52   : > { %p3745_p1 = pnand %p3743_p12, %p3740_p10 }
  0x54   : > { %3748 = shalt.err (!%p3745_p1)
}
  0x55   : > { %s3749_s12 = scalar_lea.vmem %s4049_s29, 2048  ;;  %p3757_p7 = scmp.lt.s32.totalorder %s4049_s29, %s4049_s29 }
  0x56   : > { %p3750_p4 = scmp.ne.s32.totalorder %s4049_s29, %s3749_s12  ;;  %p3758_p9 = scmp.lt.s32.totalorder %s3749_s12, %s3749_s12 }
  0x58   : > { %p3752_p5 = pnand %p3750_p4, %p4033_p2  ;;  %p3759_p11 = por %p3758_p9, %p3757_p7 }
  0x5a   : > { %p3753_p6 = pneg %p3752_p5 }
  0x5c   : > { %p3760_p13 = pnand %p3759_p11, %p3753_p6 }
  0x5e   : > { %3763 = shalt.err (!%p3760_p13)
}
  0x5f   : > { %s3875_s17 = smov 128   ;;  %s3876_s23 = smov 8  }
  0x60   : > { %3463 = dma.hbm_to_vmem [thread:$0]  (!%p4021_p0), %s4539_s5, 2048, %s4049_s29, [#allocation9], %s3875_s17, %s3875_s17, %s3876_s23  }
  0x61   : > { %p4568_p3 = scmp.ne.s32.totalorder %s4563_s19, 0 }
  0x62   : > { %p4569_p2 = scmp.ne.s32.totalorder (!%p4568_p3), %s4564_s20, 0 }
  0x63   : > { %256 = sbr.rel (%p4568_p3) target bundleno = 1142 (0x476), region = 44 }
  0x6a   : > { %3825 = dma.done.wait (%p4569_p2), [#allocation6], 2048  }
  0x6b   : > { %3827 = vsyncadd (%p4569_p2), [#allocation6], 4294965248 }
  0x6c   : > { %3829 = dma.done.wait (%p4569_p2), [#allocation9], 11264  }
  0x6d   : > { %3831 = vsyncadd (%p4569_p2), [#allocation9], 4294956032  ;;  %s4553_s29 = sand.u32 1, %s3844_s25   ;;  %p291_p0 = scmp.lt.s32.totalorder %s3852_s27, 0 }
  0x6e   : > { %s2829_s19 = sshll.u32 %s4553_s29, 6  ;;  %s292_s22 = ssub.s32 0, %s3852_s27 }
  0x6f   : > { %s2830_s13 = smin.u32 %s3852_s27, %s292_s22  ;;  %p2833_p8 = scmp.ne.s32.totalorder %s3852_s27, 0 }
  0x70   : > { %s294_s16 = sand.u32 1, %s2830_s13   ;;  %p3474_p10 = scmp.eq.s32.totalorder %s3852_s27, 0 }
  0x71   : > { %s295_s26 = ssub.s32 0, %s294_s16  ;;  %s4112_s21 = scalar_lea.vmem [#allocation11], %s2829_s19 }
  0x72   : > { %s4591_s26 = smov (!%p291_p0, %s295_s26), %s294_s16 }
  0x73   : > { %p2832_p12 = scmp.lt.s32.totalorder %s4591_s26, 0  ;;  %s301_s20 = sadd.s32 2, %s4591_s26 }
  0x75   : > { %s4593_s20 = smov (!%p2832_p12, %s301_s20), %s4591_s26 }
  0x76   : > { %s2978_s9 = smul.u32 4608, %s3856_s28  ;;  %s3877_s12 = smov [#allocation2]  }
  0x77   : > { %s3429_s18 = scalar_select %p3474_p10, [#allocation0], [#allocation16] }
  0x78   : > { %s309_s10 = scalar_lea.hbm %s4534_s0, %s2978_s9  ;;  %s322_s17 = sshll.u32 %s3877_s12, 4  ;;  %s323_s17 = int_to_ptr.vmem [resolvable:$true] %s322_s17 }
  0x79   : > { %s314_s23 = sld [smem:[%s3429_s18]]   ;;  %s3878_s30 = smov 256  }
  0x7a   : > { %3430 = sst [smem:[#allocation13]] (%p3474_p10), %s3878_s30  ;;  %s3879_s24 = smov 2  }
  0x7b   : > { %3431 = sst [smem:[#allocation13 + $0x1]] (%p3474_p10), %s3878_s30  ;;  %s3880_s19 = smov 64  }
  0x7c   : > { %3432 = sst [smem:[#allocation13 + $0x2]] (%p3474_p10), %s3879_s24  ;;  %s3881_s13 = smov 128  }
  0x7d   : > { %3433 = sst [smem:[#allocation13 + $0x3]] (%p3474_p10), %s3880_s19  ;;  %s3882_s26 = smov 4  }
  0x7e   : > { %3434 = sst [smem:[#allocation13 + $0x4]] (%p3474_p10), %s3881_s13  ;;  %s3883_s9 = smov [#allocation4]  }
  0x7f   : > { %s2835_s22 = sshll.u32 %s314_s23, 26  ;;  %3435 = sst [smem:[#allocation13 + $0x5]] (%p3474_p10), %s3879_s24 }
  0x80   : > { %s2836_s16 = sadd.s32 134217728, %s2835_s22  ;;  %3436 = sst [smem:[#allocation13 + $0x6]] (%p3474_p10), %s3881_s13 }
  0x81   : > { %3437 = sst [smem:[#allocation13 + $0x7]] (%p3474_p10), %s3880_s19  ;;  %s3884_s18 = smov [#allocation12]  }
  0x82   : > { %3438 = sst [smem:[#allocation13 + $0x8]] (%p3474_p10), %s3882_s26  ;;  %s345_s14 = sadd.s32 1, %s3852_s27 }
  0x83   : > { %3439 = dma.general (%p3474_p10), %s309_s10, 1536, %s323_s17, %s3883_s9, %s3884_s18, [#allocation13], %s2836_s16, 0  }
  0x84   : > { %p4141_p1 = scmp.lt.s32.totalorder %s345_s14, 4 }
  0x85   : > { %s350_s12 = ssub.s32 1, %s4593_s20  ;;  %s2979_s23 = sshll.u32 %s3852_s27, 6 }
  0x86   : > { %s2980_s30 = sadd.s32 64, %s2979_s23  ;;  %s355_s24 = smul.u32 72, %s3856_s28 }
  0x87   : > { %s352_s19 = sshra.s32 %s2980_s30, 3  ;;  %s2981_s10 = smul.u32 96, %s350_s12 }
  0x88   : > { %s2839_s17 = sshll.u32 %s352_s19, 1  ;;  %s3885_s30 = smov 256  }
  0x89   : > { %s356_s22 = sadd.s32 %s2839_s17, %s355_s24  ;;  %s361_s18 = scalar_lea.vmem [#allocation2], %s2981_s10 }
  0x8a   : > { %s2840_s13 = sshll.u32 %s356_s22, 6  ;;  %s375_s14 = sshll.u32 %s361_s18, 4  ;;  %s376_s14 = int_to_ptr.vmem [resolvable:$true] %s375_s14 }
  0x8b   : > { %s358_s9 = scalar_lea.hbm %s4534_s0, %s2840_s13  ;;  %3442 = sst [smem:[#allocation15]] (%p4141_p1), %s3885_s30 }
  0x8c   : > { %s3441_s23 = scalar_select %p4141_p1, [#allocation0], [#allocation17] }
  0x8d   : > { %3443 = sst [smem:[#allocation15 + $0x1]] (%p4141_p1), %s3885_s30  ;;  %s3886_s24 = smov 2  }
  0x8e   : > { %s367_s29 = sld [smem:[%s3441_s23]]   ;;  %s3887_s19 = smov 64  }
  0x8f   : > { %3444 = sst [smem:[#allocation15 + $0x2]] (%p4141_p1), %s3886_s24  ;;  %s3888_s10 = smov 128  }
  0x90   : > { %3445 = sst [smem:[#allocation15 + $0x3]] (%p4141_p1), %s3887_s19  ;;  %s3889_s13 = smov 4  }
  0x91   : > { %3446 = sst [smem:[#allocation15 + $0x4]] (%p4141_p1), %s3888_s10  ;;  %s362_s16 = scalar_lea.sflag [#allocation4], %s350_s12 }
  0x92   : > { %3447 = sst [smem:[#allocation15 + $0x5]] (%p4141_p1), %s3886_s24  ;;  %s3890_s26 = smov [#allocation14]  }
  0x93   : > { %3448 = sst [smem:[#allocation15 + $0x6]] (%p4141_p1), %s3888_s10  ;;  %s2982_s18 = smul.u32 96, %s4593_s20 }
  0x94   : > { %s2842_s17 = sshll.u32 %s367_s29, 26  ;;  %3449 = sst [smem:[#allocation15 + $0x7]] (%p4141_p1), %s3887_s19 }
  0x95   : > { %s2843_s22 = sadd.s32 134217728, %s2842_s17  ;;  %3450 = sst [smem:[#allocation15 + $0x8]] (%p4141_p1), %s3889_s13 }
  0x96   : > { %3451 = dma.general (%p4141_p1), %s358_s9, 1536, %s376_s14, %s362_s16, %s3890_s26, [#allocation15], %s2843_s22, 0  }
  0x97   : > { %s4178_s23 = scalar_lea.vmem [#allocation2], %s2982_s18  ;;  %s401_s30 = scalar_lea.sflag [#allocation4], %s4593_s20 }
  0x98   : > { %3832 = dma.done.wait %s401_s30, 1536 }
  0x99   : > { %3833 = vsyncadd %s401_s30, 4294965760  ;;  %v3891_v0 = vmov 0   ;;  %v3568_v1 = vld [vmem:[#allocation5 + $0x40] sm:$0xff]   ;;  %v3570_v3 = vld [vmem:[#allocation5 + $0x48] sm:$0xff]   ;;  %vm658_vm0 = vcmask 1043456  }
  0x9a   : > { %684 = vst [vmem:[#allocation3] sm:$0xf] %v3891_v0  ;;  %685 = vst [vmem:[#allocation3 + $0x30] sm:$0xf0] %v3891_v0  ;;  %v3569_v2 = vld [vmem:[#allocation5] sm:$0xff]   ;;  %2992 = vmatprep.subr.bf16.mxu0 %v3568_v1  ;;  %v3571_v4 = vld [vmem:[#allocation5 + $0x8] sm:$0xff]  }
  0x9b   : > { %2993 = vmatpush3.bf16.msra.mxu0 %v3569_v2  ;;  %v3572_v5 = vld [vmem:[#allocation5 + $0x50] sm:$0xff]   ;;  %v3574_v7 = vld [vmem:[#allocation5 + $0x58] sm:$0xff]   ;;  %v3576_v9 = vld [vmem:[#allocation5 + $0x60] sm:$0xff]  }
  0x9c   : > { %2994 = vmatprep.subr.bf16.mxu0 %v3570_v3  ;;  %v3573_v6 = vld [vmem:[#allocation5 + $0x10] sm:$0xff]   ;;  %v3575_v8 = vld [vmem:[#allocation5 + $0x18] sm:$0xff]   ;;  %v3577_v10 = vld [vmem:[#allocation5 + $0x20] sm:$0xff]  }
  0x9d   : > { %v3578_v11 = vld [vmem:[#allocation5 + $0x68] sm:$0xff]   ;;  %v407_v12 = vld [vmem:[%s4178_s23 + $0x8] sm:$0xff]  ;;  %v3582_v16 = vld [vmem:[#allocation5 + $0x78] sm:$0xff]  }
  0x9e   : > { %585 = vmatprep.mubr.bf16.mxu0 %v407_v12  ;;  %v3579_v13 = vld [vmem:[#allocation5 + $0x28] sm:$0xff]   ;;  %v3580_v14 = vld [vmem:[#allocation5 + $0x70] sm:$0xff]   ;;  %v3583_v17 = vld [vmem:[#allocation5 + $0x38] sm:$0xff]  }
  0x9f   : > { %2995 = vmatpush3.bf16.msra.mxu0 %v3571_v4  ;;  %v3581_v15 = vld [vmem:[#allocation5 + $0x30] sm:$0xff]   ;;  %v406_v18 = vld [vmem:[%s4178_s23] sm:$0xff]  ;;  %v4186_v19 = vld [vmem:[%s4178_s23 + $0x18] sm:$0xff] }
  0xa0   : > { %2996 = vmatprep.subr.bf16.mxu0 %v3572_v5  ;;  %v4190_v20 = vld [vmem:[%s4178_s23 + $0x10] sm:$0xff]  ;;  %v4193_v21 = vld [vmem:[%s4178_s23 + $0x28] sm:$0xff]  ;;  %v4198_v22 = vld [vmem:[%s4178_s23 + $0x20] sm:$0xff] }
  0xa1   : > { %v4201_v23 = vld [vmem:[%s4178_s23 + $0x38] sm:$0xff]  ;;  %v4206_v24 = vld [vmem:[%s4178_s23 + $0x30] sm:$0xff]  ;;  %v4209_v25 = vld [vmem:[%s4178_s23 + $0x48] sm:$0xff] }
  0xa2   : > { %v4214_v26 = vld [vmem:[%s4178_s23 + $0x40] sm:$0xff]  ;;  %v417_v27 = vld [vmem:[%s4178_s23 + $0x58] sm:$0xff]  ;;  %v416_v28 = vld [vmem:[%s4178_s23 + $0x50] sm:$0xff] }
  0xa3   : > { %2997 = vmatpush3.bf16.msra.mxu0 %v3573_v6  ;;  %v4222_v30 = vld [vmem:[%s4536_s2] ss:$0 sm:$0xff] }
  0xa4   : > { %2998 = vmatprep.subr.bf16.mxu0 %v3574_v7 }
  0xa7   : > { %2999 = vmatpush3.bf16.msra.mxu0 %v3575_v8 }
  0xa8   : > { %3000 = vmatprep.subr.bf16.mxu0 %v3576_v9 }
  0xab   : > { %3001 = vmatpush3.bf16.msra.mxu0 %v3577_v10 }
  0xac   : > { %3002 = vmatprep.subr.bf16.mxu0 %v3578_v11 }
  0xaf   : > { %3003 = vmatpush3.bf16.msra.mxu0 %v3579_v13 }
  0xb0   : > { %3004 = vmatprep.subr.bf16.mxu0 %v3580_v14 }
  0xb3   : > { %3005 = vmatpush3.bf16.msra.mxu0 %v3581_v15 }
  0xb4   : > { %3006 = vmatprep.subr.bf16.mxu0 %v3582_v16 }
  0xb7   : > { %3007 = vmatpush3.bf16.msra.mxu0 %v3583_v17 }
  0xba   : > { %586 = vmatmul.mubr.bf16.vlgmr.msra.gmra.mrb[0].mxu0 %v406_v18 }
  0xbb   : > { %593 = vmatprep.mubr.bf16.mxu0 %v4186_v19 }
  0xc2   : > { %594 = vmatmul.mubr.bf16.gmra.mrb[4].mxu0 %v4190_v20 }
  0xc3   : > { %601 = vmatprep.mubr.bf16.mxu0 %v4193_v21 }
  0xca   : > { %602 = vmatmul.mubr.bf16.gmra.mrb[8].mxu0 %v4198_v22 }
  0xcb   : > { %609 = vmatprep.mubr.bf16.mxu0 %v4201_v23 }
  0xd2   : > { %610 = vmatmul.mubr.bf16.gmra.mrb[12].mxu0 %v4206_v24 }
  0xd3   : > { %617 = vmatprep.mubr.bf16.mxu0 %v4209_v25 }
  0xda   : > { %618 = vmatmul.mubr.bf16.gmra.mrb[16].mxu0 %v4214_v26 }
  0xdb   : > { %625 = vmatprep.mubr.bf16.mxu0 %v417_v27 }
  0xe2   : > { %626 = vmatmul.mubr.bf16.gmra.mrb[20].mxu0 %v416_v28 }
 0x18d   : > { %v3008_v29 = vpop.f32.mrb[0].mxu0 }
 0x18e   : > { %v3009_v31 = vpop.f32.mrb[1].mxu0 }
 0x18f   : > { %v3010_v32 = vadd.f32 %v3009_v31, %v3008_v29  ;;  %v3011_v33 = vpop.f32.mrb[2].mxu0 }
 0x190   : > { %v3012_v34 = vpop.f32.mrb[3].mxu0 }
 0x191   : > { %v588_v35 = vadd.f32 %v3010_v32, %v4222_v30  ;;  %v3013_v36 = vadd.f32 %v3012_v34, %v3011_v33 }
 0x193   : > { %v591_v37 = vadd.f32 %v3013_v36, %v4222_v30  ;;  %v634_v38 = vmax.f32 %v588_v35, 0.0 }
 0x195   : > { %v635_v39 = vmax.f32 %v591_v37, 0.0  ;;  %v3014_v40 = vpop.f32.mrb[4].mxu0 }
 0x196   : > { %v3015_v41 = vpop.f32.mrb[5].mxu0 }
 0x197   : > { %v646_v42 = vpack.c.bf16 %v635_v39, %v634_v38  ;;  %v3016_v43 = vadd.f32 %v3015_v41, %v3014_v40  ;;  %v3017_v44 = vpop.f32.mrb[6].mxu0 }
 0x198   : > { %v3018_v45 = vpop.f32.mrb[7].mxu0 }
 0x199   : > { %v659_v46 = vrot.slane %v646_v42, 4  ;;  %v596_v47 = vadd.f32 %v3016_v43, %v4222_v30  ;;  %v3019_v48 = vadd.f32 %v3018_v45, %v3017_v44 }
 0x19b   : > { %677 = vst [vmem:[#allocation3] sm:$0xf0] %v659_v46  ;;  %v599_v49 = vadd.f32 %v3019_v48, %v4222_v30  ;;  %v636_v50 = vmax.f32 %v596_v47, 0.0 }
 0x19d   : > { %v637_v51 = vmax.f32 %v599_v49, 0.0  ;;  %v3020_v52 = vpop.f32.mrb[8].mxu0 }
 0x19e   : > { %v3021_v53 = vpop.f32.mrb[9].mxu0 }
 0x19f   : > { %v647_v54 = vpack.c.bf16 %v637_v51, %v636_v50  ;;  %v3022_v55 = vadd.f32 %v3021_v53, %v3020_v52  ;;  %v3023_v56 = vpop.f32.mrb[10].mxu0  ;;  %v3892_v53 = vmov (!%p2833_p8), 0  }
 0x1a0   : > { %v3024_v57 = vpop.f32.mrb[11].mxu0  ;;  %689 = vst [vmem:[#allocation3] sm:$0xf0] (!%p2833_p8), %v3892_v53 }
 0x1a1   : > { %v660_v58 = vrot.slane %v647_v54, 4  ;;  %v604_v59 = vadd.f32 %v3022_v55, %v4222_v30  ;;  %v3025_v60 = vadd.f32 %v3024_v57, %v3023_v56 }
 0x1a3   : > { %v661_v61 = vsel %vm658_vm0, %v659_v46, %v660_v58  ;;  %v607_v62 = vadd.f32 %v3025_v60, %v4222_v30  ;;  %v638_v63 = vmax.f32 %v604_v59, 0.0 }
 0x1a4   : > { %678 = vst [vmem:[#allocation3 + $0x8] sm:$0xff] %v661_v61 }
 0x1a5   : > { %v639_v1 = vmax.f32 %v607_v62, 0.0  ;;  %v3026_v2 = vpop.f32.mrb[12].mxu0  ;;  %690 = vst [vmem:[#allocation3 + $0x8] sm:$0xf] (!%p2833_p8), %v3892_v53 }
 0x1a6   : > { %v3027_v3 = vpop.f32.mrb[13].mxu0 }
 0x1a7   : > { %v648_v4 = vpack.c.bf16 %v639_v1, %v638_v63  ;;  %v3028_v5 = vadd.f32 %v3027_v3, %v3026_v2  ;;  %v3029_v6 = vpop.f32.mrb[14].mxu0 }
 0x1a8   : > { %v3030_v7 = vpop.f32.mrb[15].mxu0 }
 0x1a9   : > { %v662_v8 = vrot.slane %v648_v4, 4  ;;  %v612_v9 = vadd.f32 %v3028_v5, %v4222_v30  ;;  %v3031_v10 = vadd.f32 %v3030_v7, %v3029_v6 }
 0x1ab   : > { %v663_v11 = vsel %vm658_vm0, %v660_v58, %v662_v8  ;;  %v615_v12 = vadd.f32 %v3031_v10, %v4222_v30  ;;  %v640_v13 = vmax.f32 %v612_v9, 0.0 }
 0x1ac   : > { %679 = vst [vmem:[#allocation3 + $0x10] sm:$0xff] %v663_v11 }
 0x1ad   : > { %v641_v14 = vmax.f32 %v615_v12, 0.0  ;;  %v3032_v15 = vpop.f32.mrb[16].mxu0 }
 0x1ae   : > { %v3033_v16 = vpop.f32.mrb[17].mxu0 }
 0x1af   : > { %v649_v17 = vpack.c.bf16 %v641_v14, %v640_v13  ;;  %v3034_v18 = vadd.f32 %v3033_v16, %v3032_v15  ;;  %v3035_v27 = vpop.f32.mrb[18].mxu0 }
 0x1b0   : > { %v3036_v28 = vpop.f32.mrb[19].mxu0 }
 0x1b1   : > { %v664_v29 = vrot.slane %v649_v17, 4  ;;  %v620_v31 = vadd.f32 %v3034_v18, %v4222_v30  ;;  %v3037_v32 = vadd.f32 %v3036_v28, %v3035_v27 }
 0x1b3   : > { %v665_v33 = vsel %vm658_vm0, %v662_v8, %v664_v29  ;;  %v623_v34 = vadd.f32 %v3037_v32, %v4222_v30  ;;  %v642_v35 = vmax.f32 %v620_v31, 0.0 }
 0x1b4   : > { %680 = vst [vmem:[#allocation3 + $0x18] sm:$0xff] %v665_v33 }
 0x1b5   : > { %v643_v36 = vmax.f32 %v623_v34, 0.0  ;;  %v3038_v37 = vpop.f32.mrb[20].mxu0 }
 0x1b6   : > { %v3039_v38 = vpop.f32.mrb[21].mxu0 }
 0x1b7   : > { %v650_v39 = vpack.c.bf16 %v643_v36, %v642_v35  ;;  %v3040_v40 = vadd.f32 %v3039_v38, %v3038_v37  ;;  %v3041_v41 = vpop.f32.mrb[22].mxu0 }
 0x1b8   : > { %v3042_v42 = vpop.f32.mrb[23].mxu0 }
 0x1b9   : > { %v666_v43 = vrot.slane %v650_v39, 4  ;;  %v628_v44 = vadd.f32 %v3040_v40, %v4222_v30  ;;  %v3043_v45 = vadd.f32 %v3042_v42, %v3041_v41 }
 0x1bb   : > { %v667_v46 = vsel %vm658_vm0, %v664_v29, %v666_v43  ;;  %v631_v47 = vadd.f32 %v3043_v45, %v4222_v30  ;;  %v644_v48 = vmax.f32 %v628_v44, 0.0 }
 0x1bc   : > { %681 = vst [vmem:[#allocation3 + $0x20] sm:$0xff] %v667_v46 }
 0x1bd   : > { %v645_v49 = vmax.f32 %v631_v47, 0.0 }
 0x1be   : > { %688 = sbr.rel (%p2833_p8) target bundleno = 453 (0x1c5), region = 68 }
 0x1bf   : > { %v651_v50 = vpack.c.bf16 %v645_v49, %v644_v48 }
 0x1c1   : > { %v668_v51 = vrot.slane %v651_v50, 4 }
 0x1c3   : > { %v669_v52 = vsel %vm658_vm0, %v666_v43, %v668_v51  ;;  %683 = vst [vmem:[#allocation3 + $0x30] sm:$0xf] %v668_v51 }
 0x1c4   : > { %682 = vst [vmem:[#allocation3 + $0x28] sm:$0xff] %v669_v52 }
 0x1c5 PF: > { %p2863_p4 = scmp.ne.s32.totalorder %s3852_s27, 3 }
 0x1c6   : > { %v3893_v30 = vmov (!%p2863_p4), 0  }
 0x1c7   : > { %694 = sbr.rel (%p2863_p4) target bundleno = 462 (0x1ce), region = 72  ;;  %695 = vst [vmem:[#allocation3 + $0x28] sm:$0xf0] (!%p2863_p4), %v3893_v30  ;;  %696 = vst [vmem:[#allocation3 + $0x30] sm:$0xf] (!%p2863_p4), %v3893_v30 }
 0x1ce PF: > { %v3584_v54 = vld [vmem:[#allocation8 + $0xc0] sm:$0xff]   ;;  %v3586_v56 = vld [vmem:[#allocation8 + $0xc8] sm:$0xff]   ;;  %v3588_v58 = vld [vmem:[#allocation8 + $0xd0] sm:$0xff]   ;;  %vm891_vm1 = vsmask.f32 4352  ;;  %s2991_s24 = sshll.u32 %s3852_s27, 4 }
 0x1cf   : > { %v3585_v55 = vld [vmem:[#allocation8 + $0x100] sm:$0xff]   ;;  %3152 = vmatprep.subr.bf16.mxu1 %v3584_v54  ;;  %v3587_v57 = vld [vmem:[#allocation8 + $0x108] sm:$0xff]   ;;  %v3589_v59 = vld [vmem:[#allocation8 + $0x110] sm:$0xff]   ;;  %vm1896_vm2 = vsmask.f32 3328  ;;  %s2972_s19 = sshll.u32 %s3856_s28, 6 }
 0x1d0   : > { %3224 = vmatprep.subr.bf16.mxu0 %v3585_v55  ;;  %3153 = vmatpush3.bf16.msra.mxu1 %v3584_v54  ;;  %v3590_v60 = vld [vmem:[#allocation8 + $0xd8] sm:$0xff]   ;;  %v3592_v62 = vld [vmem:[#allocation8 + $0xe0] sm:$0xff]   ;;  %v3594_v1 = vld [vmem:[#allocation8 + $0xe8] sm:$0xff]   ;;  %s2695_s27 = sadd.s32 %s2991_s24, %s2972_s19  ;;  %s2698_s10 = sshll.u32 %s4112_s21, 4  ;;  %s4476_s10 = int_to_ptr.vmem [resolvable:$true] %s2698_s10 }
 0x1d1   : > { %3225 = vmatpush3.bf16.msra.mxu0 %v3585_v55  ;;  %3154 = vmatprep.subr.bf16.mxu1 %v3586_v56  ;;  %v3591_v61 = vld [vmem:[#allocation8 + $0x118] sm:$0xff]   ;;  %v3593_v63 = vld [vmem:[#allocation8 + $0x120] sm:$0xff]   ;;  %v3595_v2 = vld [vmem:[#allocation8 + $0x128] sm:$0xff]   ;;  %s2973_s28 = sshll.u32 %s2695_s27, 6  ;;  %s4571_s16 = sand.u32 1, %s3844_s25  }
 0x1d2   : > { %3226 = vmatprep.subr.bf16.mxu0 %v3587_v57  ;;  %v852_v3 = vld [vmem:[#allocation3 + $0x10] sm:$0xff]  ;;  %v871_v4 = vld [vmem:[#allocation3 + $0x8] sm:$0xf8]  ;;  %v853_v28 = vld [vmem:[#allocation3 + $0x18] sm:$0xff]  ;;  %s4474_s13 = scalar_lea.hbm %s4541_s7, %s2973_s28  ;;  %s4482_s26 = scalar_lea.sflag [#allocation7], %s4571_s16 }
 0x1d3   : > { %v893_v5 = vshrl.u32 %v871_v4, 16  ;;  %v896_v6 = vshll.u32 %v871_v4, 16  ;;  %v901_v7 = vshrl.u32 %v852_v3, 16  ;;  %v904_v8 = vshll.u32 %v852_v3, 16  ;;  %v3596_v9 = vld [vmem:[#allocation8 + $0xf0] sm:$0xff]   ;;  %v3598_v36 = vld [vmem:[#allocation8 + $0xf8] sm:$0xff]  }
 0x1d4   : > { %3155 = vmatpush3.bf16.msra.mxu1 %v3586_v56  ;;  %v1421_v10 = vld [vmem:[#allocation3 + $0x8] sm:$0xf0]  ;;  %v4244_v11 = vrot.slane %v852_v3, 4  ;;  %v910_v32 = vshrl.u32 %v853_v28, 16  ;;  %v913_v33 = vshll.u32 %v853_v28, 16  ;;  %v3599_v41 = vld [vmem:[#allocation8 + $0x138] sm:$0xff]  }
 0x1d5   : > { %3227 = vmatpush3.bf16.msra.mxu0 %v3587_v57  ;;  %3156 = vmatprep.subr.bf16.mxu1 %v3588_v58  ;;  %v3597_v12 = vld [vmem:[#allocation8 + $0x130] sm:$0xff]   ;;  %v895_v13 = vrot.slane %v893_v5, 3  ;;  %v898_v14 = vrot.slane %v896_v6, 4  ;;  %v903_v15 = vrot.slane %v901_v7, 3  ;;  %v906_v16 = vrot.slane %v904_v8, 4  ;;  %v3600_v47 = vld [vmem:[#allocation8] sm:$0xff]  }
 0x1d6   : > { %3228 = vmatprep.subr.bf16.mxu0 %v3589_v59  ;;  %v1444_v17 = vrot.slane %v1421_v10, 4  ;;  %v1898_v18 = vshrl.u32 %v1421_v10, 16  ;;  %v1901_v27 = vshll.u32 %v1421_v10, 16  ;;  %v912_v39 = vrot.slane %v910_v32, 3  ;;  %v3601_v51 = vld [vmem:[#allocation8 + $0x40] sm:$0xff]   ;;  %v3602_v54 = vld [vmem:[#allocation8 + $0x8] sm:$0xff]  }
 0x1d7   : > { %v899_v29 = vor.u32 %v898_v14, %v895_v13  ;;  %v4246_v31 = vor.u32 %v906_v16, %v903_v15  ;;  %v915_v40 = vrot.slane %v913_v33, 4  ;;  %v1905_v42 = vrot.slane %v901_v7, 4  ;;  %v4270_v55 = vld [vmem:[#allocation3 + $0x20] sm:$0xff]  ;;  %v4296_v13 = vld [vmem:[#allocation3 + $0x8] sm:$0xff]  ;;  %v3606_v14 = vld [vmem:[#allocation8 + $0x18] sm:$0xff]   ;;  %s3764_s18 = scalar_lea.vmem %s4476_s10, 1024 }
 0x1d8   : > { %3157 = vmatpush3.bf16.msra.mxu1 %v3588_v58  ;;  %v1446_v34 = vsel %vm658_vm0, %v1444_v17, %v4244_v11  ;;  %v1900_v35 = vrot.slane %v1898_v18, 4  ;;  %v1903_v38 = vrot.slane %v1901_v27, 5  ;;  %v1906_v43 = vrot.slane %v904_v8, 5  ;;  %v3605_v8 = vld [vmem:[#allocation8 + $0x50] sm:$0xff]   ;;  %p3765_p5 = scmp.ne.s32.totalorder %s4476_s10, %s3764_s18  ;;  %p4572_p6 = scmp.ne.s32.totalorder %s4559_s15, 0 }
 0x1d9   : > { %3229 = vmatpush3.bf16.msra.mxu0 %v3589_v59  ;;  %3158 = vmatprep.subr.bf16.mxu1 %v3590_v60  ;;  %v908_v37 = vsel %vm891_vm1, %v899_v29, %v4246_v31  ;;  %v4252_v44 = vor.u32 %v915_v40, %v912_v39  ;;  %v4254_v45 = vrot.slane %v853_v28, 4  ;;  %v1909_v46 = vrot.slane %v910_v32, 4  ;;  %v1403_v32 = vld [vmem:[#allocation3] sm:$0xf0]  ;;  %s3895_s23 = smov [#allocation11]  }
 0x1da   : > { %3230 = vmatprep.subr.bf16.mxu0 %v3591_v61  ;;  %3240 = vmatprep.mubr.bf16.mxu0 %v1446_v34  ;;  %v1904_v48 = vor.u32 %v1903_v38, %v1900_v35  ;;  %v4256_v49 = vor.u32 %v1906_v43, %v1905_v42  ;;  %v1910_v50 = vrot.slane %v913_v33, 5  ;;  %v919_v56 = vshrl.u32 %v4270_v55, 16  ;;  %v3607_v38 = vld [vmem:[#allocation8 + $0x58] sm:$0xff]   ;;  %p3766_p7 = pnand %p3765_p5, %p4572_p6  ;;  %s3768_s30 = sshll.u32 %s3895_s23, 4  ;;  %s3769_s30 = int_to_ptr.vmem [resolvable:$false] %s3768_s30 }
 0x1db   : > { %3168 = vmatprep.mubr.bf16.mxu1 %v908_v37  ;;  %v4263_v53 = vsel %vm891_vm1, %v4246_v31, %v4252_v44  ;;  %v4268_v30 = vsel %vm658_vm0, %v4244_v11, %v4254_v45  ;;  %v922_v57 = vshll.u32 %v4270_v55, 16  ;;  %v1062_v18 = vshrl.u32 %v4296_v13, 16  ;;  %s3770_s29 = scalar_lea.vmem %s3769_s30, 2048  ;;  %p3771_p11 = scmp.lt.s32.totalorder %s4476_s10, %s3769_s30 }
 0x1dc   : > { %3159 = vmatpush3.bf16.msra.mxu1 %v3590_v60  ;;  %v4258_v52 = vor.u32 %v1910_v50, %v1909_v46  ;;  %v4276_v58 = vsel %vm1896_vm2, %v1904_v48, %v4256_v49  ;;  %v3603_v60 = vld [vmem:[#allocation8 + $0x48] sm:$0xff]   ;;  %v1065_v29 = vshll.u32 %v4296_v13, 16  ;;  %v1574_v33 = vrot.slane %v4296_v13, 4  ;;  %v3608_v50 = vld [vmem:[#allocation8 + $0x20] sm:$0xff]   ;;  %p3767_p9 = pneg %p3766_p7  ;;  %p3772_p13 = scmp.lt.s32.totalorder %s3770_s29, %s3764_s18 }
 0x1dd   : > { %3231 = vmatpush3.bf16.msra.mxu0 %v3591_v61  ;;  %3160 = vmatprep.subr.bf16.mxu1 %v3592_v62  ;;  %v4284_v61 = vrot.slane %v4270_v55, 4  ;;  %v1573_v37 = vrot.slane %v1403_v32, 4  ;;  %v2047_v42 = vshll.u32 %v1403_v32, 16  ;;  %v1913_v48 = vrot.slane %v919_v56, 4 }
 0x1de   : > { %3232 = vmatprep.subr.bf16.mxu0 %v3593_v63  ;;  %v4281_v59 = vsel %vm1896_vm2, %v4256_v49, %v4258_v52  ;;  %v1067_v40 = vrot.slane %v1065_v29, 4  ;;  %p3773_p3 = por %p3772_p13, %p3771_p11 }
 0x1df   : > { %v4291_v3 = vsel %vm658_vm0, %v4254_v45, %v4284_v61  ;;  %v1575_v46 = vsel %vm658_vm0, %v1573_v37, %v1574_v33  ;;  %v4333_v37 = vld [vmem:[#allocation3 + $0x28] sm:$0xff] }
 0x1e0   : > { %3161 = vmatpush3.bf16.msra.mxu1 %v3592_v62  ;;  %v921_v62 = vrot.slane %v919_v56, 3  ;;  %p3774_p2 = pnand %p3773_p3, %p3767_p9 }
 0x1e1   : > { %3233 = vmatpush3.bf16.msra.mxu0 %v3593_v63  ;;  %3162 = vmatprep.subr.bf16.mxu1 %v3594_v1  ;;  %v924_v63 = vrot.slane %v922_v57, 4 }
 0x1e2   : > { %3234 = vmatprep.subr.bf16.mxu0 %v3595_v2 }
 0x1e3   : > { %v4293_v7 = vor.u32 %v924_v63, %v921_v62  ;;  %v2049_v63 = vrot.slane %v2047_v42, 5  ;;  %v3619_v42 = vld [vmem:[#allocation8 + $0x1c8] sm:$0xff]  }
 0x1e4   : > { %3163 = vmatpush3.bf16.msra.mxu1 %v3594_v1  ;;  %v873_v1 = vld [vmem:[#allocation3 + $0x28] sm:$0xf] }
 0x1e5   : > { %3235 = vmatpush3.bf16.msra.mxu0 %v3595_v2  ;;  %3164 = vmatprep.subr.bf16.mxu1 %v3596_v9  ;;  %v3604_v2 = vld [vmem:[#allocation8 + $0x10] sm:$0xff]   ;;  %v928_v4 = vshrl.u32 %v873_v1, 16  ;;  %v931_v5 = vshll.u32 %v873_v1, 16  ;;  %v1451_v6 = vrot.slane %v873_v1, 4  ;;  %v4301_v15 = vsel %vm891_vm1, %v4252_v44, %v4293_v7 }
 0x1e6   : > { %3236 = vmatprep.subr.bf16.mxu0 %v3597_v12  ;;  %v2051_v1 = vrot.slane %v1062_v18, 4 }
 0x1e7   : > { %v933_v10 = vrot.slane %v931_v5, 4  ;;  %v1452_v28 = vsel %vm658_vm0, %v4284_v61, %v1451_v6  ;;  %v3611_v5 = vld [vmem:[#allocation8 + $0x68] sm:$0xff]  }
 0x1e8   : > { %3165 = vmatpush3.bf16.msra.mxu1 %v3596_v9  ;;  %v930_v9 = vrot.slane %v928_v4, 3  ;;  %v2052_v4 = vrot.slane %v1065_v29, 5 }
 0x1e9   : > { %3237 = vmatpush3.bf16.msra.mxu0 %v3597_v12  ;;  %3166 = vmatprep.subr.bf16.mxu1 %v3598_v36  ;;  %v850_v12 = vld [vmem:[#allocation3] sm:$0xf8] }
 0x1ea   : > { %3238 = vmatprep.subr.bf16.mxu0 %v3599_v41  ;;  %v1054_v16 = vshrl.u32 %v850_v12, 16  ;;  %v1057_v17 = vshll.u32 %v850_v12, 16  ;;  %v934_v27 = vor.u32 %v933_v10, %v930_v9  ;;  %v2053_v6 = vor.u32 %v2052_v4, %v2051_v1  ;;  %v3613_v12 = vld [vmem:[#allocation8 + $0x70] sm:$0xff]  }
 0x1eb   : > { %v3621_v1 = vld [vmem:[#allocation8 + $0x1d0] sm:$0xff]  }
 0x1ec   : > { %3167 = vmatpush3.bf16.msra.mxu1 %v3598_v36  ;;  %v1056_v34 = vrot.slane %v1054_v16, 3  ;;  %v1059_v35 = vrot.slane %v1057_v17, 4  ;;  %v1064_v36 = vrot.slane %v1062_v18, 3  ;;  %v935_v39 = vsel %vm891_vm1, %v4293_v7, %v934_v27  ;;  %v3614_v16 = vld [vmem:[#allocation8 + $0x38] sm:$0xff]  }
 0x1ed   : > { %3239 = vmatpush3.bf16.msra.mxu0 %v3599_v41  ;;  %3176 = vmatprep.subr.bf16.mxu1 %v3600_v47  ;;  %v2044_v41 = vshrl.u32 %v1403_v32, 16  ;;  %v4327_v10 = vsel %vm1896_vm2, %v2053_v6, %v4256_v49  ;;  %v1196_v17 = vld [vmem:[#allocation3 + $0x10] sm:$0xf8]  ;;  %v3616_v49 = vld [vmem:[#allocation8 + $0x180] sm:$0xff]  }
 0x1ee   : > { %3248 = vmatprep.subr.bf16.mxu0 %v3601_v51  ;;  %v1060_v43 = vor.u32 %v1059_v35, %v1056_v34  ;;  %v3615_v18 = vld [vmem:[#allocation8 + $0x78] sm:$0xff]   ;;  %v1219_v29 = vshrl.u32 %v1196_v17, 16  ;;  %v3617_v35 = vld [vmem:[#allocation8 + $0x1c0] sm:$0xff]  }
 0x1ef   : > { %3169 = vmatmul.mubr.bf16.vlgmr.msra.gmra.mrb[0].mxu1 %v4263_v53  ;;  %v1695_v32 = vld [vmem:[#allocation3 + $0x10] sm:$0xf0] }
 0x1f0   : > { %3177 = vmatpush3.bf16.msra.mxu1 %v3600_v47  ;;  %3241 = vmatmul.mubr.bf16.vlgmr.msra.gmra.mrb[24].mxu0 %v4268_v30  ;;  %v1068_v47 = vor.u32 %v1067_v40, %v1064_v36  ;;  %v2200_v34 = vshrl.u32 %v1695_v32, 16  ;;  %v2203_v36 = vshll.u32 %v1695_v32, 16  ;;  %v1222_v40 = vshll.u32 %v1196_v17, 16  ;;  %v3624_v17 = vld [vmem:[#allocation8 + $0x1a0] sm:$0xff]  }
 0x1f1   : > { %3249 = vmatpush3.bf16.msra.mxu0 %v3601_v51  ;;  %3178 = vmatprep.subr.bf16.mxu1 %v3602_v54  ;;  %v1914_v51 = vrot.slane %v922_v57, 5 }
 0x1f2   : > { %3250 = vmatprep.subr.bf16.mxu0 %v3603_v60  ;;  %3244 = vmatprep.mubr.bf16.mxu0 %v4291_v3  ;;  %v1069_v55 = vsel %vm891_vm1, %v1060_v43, %v1068_v47 }
 0x1f3   : > { %3172 = vmatprep.mubr.bf16.mxu1 %v4301_v15  ;;  %v4315_v62 = vor.u32 %v1914_v51, %v1913_v48  ;;  %v1576_v48 = vsel %vm658_vm0, %v1574_v33, %v4244_v11  ;;  %v2202_v51 = vrot.slane %v2200_v34, 4  ;;  %v3620_v11 = vld [vmem:[#allocation8 + $0x190] sm:$0xff]   ;;  %v3630_v34 = vld [vmem:[#allocation8 + $0x1b8] sm:$0xff]  }
 0x1f4   : > { %3179 = vmatpush3.bf16.msra.mxu1 %v3602_v54  ;;  %v3609_v54 = vld [vmem:[#allocation8 + $0x60] sm:$0xff]  }
 0x1f5   : > { %3251 = vmatpush3.bf16.msra.mxu0 %v3603_v60  ;;  %3180 = vmatprep.subr.bf16.mxu1 %v3604_v2  ;;  %v2046_v60 = vrot.slane %v2044_v41, 4  ;;  %v4320_v56 = vsel %vm1896_vm2, %v4258_v52, %v4315_v62  ;;  %v1070_v41 = vsel %vm891_vm1, %v1068_v47, %v4246_v31 }
 0x1f6   : > { %3252 = vmatprep.subr.bf16.mxu0 %v3605_v8 }
 0x1f7   : > { %3173 = vmatmul.mubr.bf16.gmra.mrb[4].mxu1 %v935_v39  ;;  %v2050_v57 = vor.u32 %v2049_v63, %v2046_v60  ;;  %v1224_v60 = vrot.slane %v1222_v40, 4 }
 0x1f8   : > { %3181 = vmatpush3.bf16.msra.mxu1 %v3604_v2  ;;  %3245 = vmatmul.mubr.bf16.gmra.mrb[28].mxu0 %v1452_v28  ;;  %v3610_v2 = vld [vmem:[#allocation8 + $0x28] sm:$0xff]  }
 0x1f9   : > { %3253 = vmatpush3.bf16.msra.mxu0 %v3605_v8  ;;  %3182 = vmatprep.subr.bf16.mxu1 %v3606_v14  ;;  %v3612_v8 = vld [vmem:[#allocation8 + $0x30] sm:$0xff]   ;;  %v4323_v9 = vsel %vm1896_vm2, %v2050_v57, %v2053_v6  ;;  %v1718_v6 = vrot.slane %v1695_v32, 4 }
 0x1fa   : > { %3254 = vmatprep.subr.bf16.mxu0 %v3607_v38  ;;  %3264 = vmatprep.mubr.bf16.mxu0 %v1575_v46  ;;  %v1221_v46 = vrot.slane %v1219_v29, 3  ;;  %v2181_v29 = vld [vmem:[#allocation3 + $0x30] sm:$0x1f] }
 0x1fb   : > { %3192 = vmatprep.mubr.bf16.mxu1 %v1069_v55  ;;  %v2205_v55 = vrot.slane %v2203_v36, 5  ;;  %v2220_v32 = vshrl.u32 %v2181_v29, 16  ;;  %v3631_v36 = vld [vmem:[#allocation8 + $0x1f8] sm:$0xff]  }
 0x1fc   : > { %3183 = vmatpush3.bf16.msra.mxu1 %v3606_v14  ;;  %v4329_v14 = vld [vmem:[#allocation3 + $0x20] sm:$0xf]  ;;  %v1225_v4 = vor.u32 %v1224_v60, %v1221_v46  ;;  %v1723_v60 = vrot.slane %v4333_v37, 4 }
 0x1fd   : > { %3255 = vmatpush3.bf16.msra.mxu0 %v3607_v38  ;;  %3184 = vmatprep.subr.bf16.mxu1 %v3608_v50  ;;  %v1072_v27 = vshrl.u32 %v4329_v14, 16  ;;  %v1075_v28 = vshll.u32 %v4329_v14, 16  ;;  %v3618_v38 = vld [vmem:[#allocation8 + $0x188] sm:$0xff]   ;;  %v2206_v63 = vor.u32 %v2205_v55, %v2202_v51  ;;  %v1577_v33 = vrot.slane %v4329_v14, 4  ;;  %v3623_v14 = vld [vmem:[#allocation8 + $0x1d8] sm:$0xff]   ;;  %v3632_v51 = vld [vmem:[#allocation8 + $0x140] sm:$0xff]  }
 0x1fe   : > { %3256 = vmatprep.subr.bf16.mxu0 %v3609_v54 }
 0x1ff   : > { %v1074_v39 = vrot.slane %v1072_v27, 3  ;;  %v1077_v43 = vrot.slane %v1075_v28, 4  ;;  %v3626_v27 = vld [vmem:[#allocation8 + $0x1a8] sm:$0xff]  }
 0x200   : > { %3185 = vmatpush3.bf16.msra.mxu1 %v3608_v50  ;;  %v1245_v50 = vshrl.u32 %v4333_v37, 16  ;;  %v3627_v28 = vld [vmem:[#allocation8 + $0x1e8] sm:$0xff]  }
 0x201   : > { %3257 = vmatpush3.bf16.msra.mxu0 %v3609_v54  ;;  %3186 = vmatprep.subr.bf16.mxu1 %v3610_v2  ;;  %v1248_v54 = vshll.u32 %v4333_v37, 16  ;;  %v1078_v47 = vor.u32 %v1077_v43, %v1074_v39 }
 0x202   : > { %3258 = vmatprep.subr.bf16.mxu0 %v3611_v5  ;;  %v2215_v31 = vrot.slane %v1245_v50, 4  ;;  %v1247_v40 = vrot.slane %v1245_v50, 3 }
 0x203   : > { %v2216_v13 = vrot.slane %v1248_v54, 5 }
 0x204   : > { %3187 = vmatpush3.bf16.msra.mxu1 %v3610_v2  ;;  %v4351_v2 = vsel %vm1896_vm2, %v2206_v63, %v4258_v52  ;;  %v1724_v63 = vsel %vm658_vm0, %v4284_v61, %v1723_v60  ;;  %v3636_v61 = vld [vmem:[#allocation8 + $0x160] sm:$0xff]  }
 0x205   : > { %3259 = vmatpush3.bf16.msra.mxu0 %v3611_v5  ;;  %3188 = vmatprep.subr.bf16.mxu1 %v3612_v8  ;;  %v2217_v57 = vor.u32 %v2216_v13, %v2215_v31  ;;  %v1079_v5 = vsel %vm891_vm1, %v4252_v44, %v1078_v47 }
 0x206   : > { %3260 = vmatprep.subr.bf16.mxu0 %v3613_v12 }
 0x208   : > { %3189 = vmatpush3.bf16.msra.mxu1 %v3612_v8  ;;  %v4358_v8 = vsel %vm1896_vm2, %v4315_v62, %v2217_v57 }
 0x209   : > { %3261 = vmatpush3.bf16.msra.mxu0 %v3613_v12  ;;  %3190 = vmatprep.subr.bf16.mxu1 %v3614_v16  ;;  %v1578_v12 = vsel %vm658_vm0, %v4254_v45, %v1577_v33 }
 0x20a   : > { %3262 = vmatprep.subr.bf16.mxu0 %v3615_v18 }
 0x20c   : > { %3191 = vmatpush3.bf16.msra.mxu1 %v3614_v16  ;;  %v1720_v16 = vsel %vm658_vm0, %v1718_v6, %v4254_v45  ;;  %v3629_v45 = vld [vmem:[#allocation8 + $0x1f0] sm:$0xff]  }
 0x20d   : > { %3263 = vmatpush3.bf16.msra.mxu0 %v3615_v18  ;;  %3200 = vmatprep.subr.bf16.mxu1 %v3616_v49  ;;  %v3625_v18 = vld [vmem:[#allocation8 + $0x1e0] sm:$0xff]  }
 0x20e   : > { %3272 = vmatprep.subr.bf16.mxu0 %v3617_v35 }
 0x20f   : > { %3193 = vmatmul.mubr.bf16.vlgmr.msra.gmra.mrb[0].mxu1 %v1070_v41  ;;  %v1250_v41 = vrot.slane %v1248_v54, 4  ;;  %v3633_v54 = vld [vmem:[#allocation8 + $0x148] sm:$0xff]  }
 0x210   : > { %3201 = vmatpush3.bf16.msra.mxu1 %v3616_v49  ;;  %3265 = vmatmul.mubr.bf16.vlgmr.msra.gmra.mrb[24].mxu0 %v1576_v48  ;;  %v2223_v49 = vshll.u32 %v2181_v29, 16  ;;  %v3647_v29 = vld [vmem:[#allocation8 + $0xb8] sm:$0xff]  }
 0x211   : > { %3273 = vmatpush3.bf16.msra.mxu0 %v3617_v35  ;;  %3202 = vmatprep.subr.bf16.mxu1 %v3618_v38  ;;  %v1200_v35 = vld [vmem:[#allocation3 + $0x30] sm:$0xf]  ;;  %v1251_v55 = vor.u32 %v1250_v41, %v1247_v40  ;;  %v3652_v41 = vld [vmem:[#allocation8 + $0x220] sm:$0xff]  }
 0x212   : > { %3274 = vmatprep.subr.bf16.mxu0 %v3619_v42  ;;  %3196 = vmatprep.mubr.bf16.mxu1 %v4263_v53  ;;  %v3622_v53 = vld [vmem:[#allocation8 + $0x198] sm:$0xff]   ;;  %v2225_v39 = vrot.slane %v2223_v49, 5  ;;  %v1254_v43 = vshrl.u32 %v1200_v35, 16  ;;  %v1257_v46 = vshll.u32 %v1200_v35, 16  ;;  %v1725_v37 = vrot.slane %v1200_v35, 4  ;;  %v3648_v49 = vld [vmem:[#allocation8 + $0x200] sm:$0xff]  }
 0x213   : > { %3268 = vmatprep.mubr.bf16.mxu0 %v4268_v30  ;;  %v1234_v30 = vsel %vm891_vm1, %v1225_v4, %v4252_v44  ;;  %v3628_v44 = vld [vmem:[#allocation8 + $0x1b0] sm:$0xff]   ;;  %v1252_v47 = vsel %vm891_vm1, %v4293_v7, %v1251_v55  ;;  %v3635_v7 = vld [vmem:[#allocation8 + $0x158] sm:$0xff]   ;;  %v3649_v35 = vld [vmem:[#allocation8 + $0x208] sm:$0xff]  }
 0x214   : > { %3203 = vmatpush3.bf16.msra.mxu1 %v3618_v38  ;;  %v2222_v38 = vrot.slane %v2220_v32, 4  ;;  %v1256_v31 = vrot.slane %v1254_v43, 3  ;;  %v1259_v50 = vrot.slane %v1257_v46, 4  ;;  %v1878_v4 = vld [vmem:[#allocation3 + $0x28] sm:$0x1f]  ;;  %v3651_v40 = vld [vmem:[#allocation8 + $0x218] sm:$0xff]  }
 0x215   : > { %3275 = vmatpush3.bf16.msra.mxu0 %v3619_v42  ;;  %3204 = vmatprep.subr.bf16.mxu1 %v3620_v11  ;;  %v1921_v6 = vshll.u32 %v1878_v4, 16  ;;  %v3658_v43 = vld [vmem:[#allocation10 + $0x4] ss:$8 sps:$4 sm:$0xff]   ;;  %v3659_v46 = vld [vmem:[#allocation10 + $0x10] ss:$8 sps:$4 sm:$0xff]  }
 0x216   : > { %3276 = vmatprep.subr.bf16.mxu0 %v3621_v1  ;;  %v2226_v42 = vor.u32 %v2225_v39, %v2222_v38  ;;  %v1260_v13 = vor.u32 %v1259_v50, %v1256_v31  ;;  %v3650_v38 = vld [vmem:[#allocation8 + $0x210] sm:$0xff]   ;;  %v3668_v50 = vld [vmem:[#allocation10 + $0x40] ss:$8 sps:$4 sm:$0xff]  }
 0x217   : > { %3197 = vmatmul.mubr.bf16.gmra.mrb[4].mxu1 %v1079_v5  ;;  %v1918_v5 = vshrl.u32 %v1878_v4, 16  ;;  %v3665_v31 = vld [vmem:[#allocation10 + $0x30] ss:$8 sps:$4 sm:$0xff]  }
 0x218   : > { %3205 = vmatpush3.bf16.msra.mxu1 %v3620_v11  ;;  %3269 = vmatmul.mubr.bf16.gmra.mrb[28].mxu0 %v1578_v12  ;;  %v4371_v48 = vsel %vm1896_vm2, %v2217_v57, %v2226_v42  ;;  %v3634_v11 = vld [vmem:[#allocation8 + $0x150] sm:$0xff]   ;;  %v1261_v33 = vsel %vm891_vm1, %v1251_v55, %v1260_v13  ;;  %v3639_v57 = vld [vmem:[#allocation8 + $0x178] sm:$0xff]   ;;  %v3662_v55 = vld [vmem:[#allocation10 + $0x20] ss:$8 sps:$4 sm:$0xff]  }
 0x219   : > { %3277 = vmatpush3.bf16.msra.mxu0 %v3621_v1  ;;  %3206 = vmatprep.subr.bf16.mxu1 %v3622_v53  ;;  %v1726_v1 = vsel %vm658_vm0, %v1723_v60, %v1725_v37  ;;  %v1920_v12 = vrot.slane %v1918_v5, 4  ;;  %v3655_v42 = vld [vmem:[#allocation8 + $0x238] sm:$0xff]   ;;  %v697_v37 = vlaneseq }
 0x21a   : > { %3278 = vmatprep.subr.bf16.mxu0 %v3623_v14  ;;  %3216 = vmatprep.mubr.bf16.mxu1 %v1234_v30  ;;  %v3667_v60 = vld [vmem:[#allocation10 + $0x34] ss:$8 sps:$4 sm:$0xff]  }
 0x21b   : > { %3288 = vmatprep.mubr.bf16.mxu0 %v1720_v16  ;;  %v3642_v16 = vld [vmem:[#allocation8 + $0x90] sm:$0xff]  }
 0x21c   : > { %3207 = vmatpush3.bf16.msra.mxu1 %v3622_v53  ;;  %v3640_v53 = vld [vmem:[#allocation8 + $0x80] sm:$0xff]   ;;  %v3679_v13 = vld [vmem:[#allocation10 + $0x74] ss:$8 sps:$4 sm:$0xff]  }
 0x21d   : > { %3279 = vmatpush3.bf16.msra.mxu0 %v3623_v14  ;;  %3208 = vmatprep.subr.bf16.mxu1 %v3624_v17  ;;  %v3641_v14 = vld [vmem:[#allocation8 + $0x88] sm:$0xff]  }
 0x21e   : > { %3280 = vmatprep.subr.bf16.mxu0 %v3625_v18 }
 0x220   : > { %3209 = vmatpush3.bf16.msra.mxu1 %v3624_v17 }
 0x221   : > { %3281 = vmatpush3.bf16.msra.mxu0 %v3625_v18  ;;  %3210 = vmatprep.subr.bf16.mxu1 %v3626_v27  ;;  %v3643_v18 = vld [vmem:[#allocation8 + $0x98] sm:$0xff]  }
 0x222   : > { %3282 = vmatprep.subr.bf16.mxu0 %v3627_v28 }
 0x224   : > { %3211 = vmatpush3.bf16.msra.mxu1 %v3626_v27  ;;  %v3644_v27 = vld [vmem:[#allocation8 + $0xa0] sm:$0xff]  }
 0x225   : > { %3283 = vmatpush3.bf16.msra.mxu0 %v3627_v28  ;;  %3212 = vmatprep.subr.bf16.mxu1 %v3628_v44  ;;  %v3645_v28 = vld [vmem:[#allocation8 + $0xa8] sm:$0xff]  }
 0x226   : > { %3284 = vmatprep.subr.bf16.mxu0 %v3629_v45 }
 0x228   : > { %3213 = vmatpush3.bf16.msra.mxu1 %v3628_v44  ;;  %v3646_v44 = vld [vmem:[#allocation8 + $0xb0] sm:$0xff]  }
 0x229   : > { %3285 = vmatpush3.bf16.msra.mxu0 %v3629_v45  ;;  %3214 = vmatprep.subr.bf16.mxu1 %v3630_v34  ;;  %v1860_v45 = vld [vmem:[#allocation3 + $0x20] sm:$0x1f] }
 0x22a   : > { %3286 = vmatprep.subr.bf16.mxu0 %v3631_v36  ;;  %v2060_v32 = vshll.u32 %v1860_v45, 16 }
 0x22c   : > { %3215 = vmatpush3.bf16.msra.mxu1 %v3630_v34 }
 0x22d   : > { %3287 = vmatpush3.bf16.msra.mxu0 %v3631_v36  ;;  %3296 = vmatprep.subr.bf16.mxu1 %v3632_v51 }
 0x22e   : > { %2520 = vmatprep.subr.bf16.mxu0 %v3658_v43 }
 0x22f   : > { %3217 = vmatmul.mubr.bf16.vlgmr.msra.gmra.mrb[0].mxu1 %v4301_v15  ;;  %v3638_v15 = vld [vmem:[#allocation8 + $0x170] sm:$0xff]  }
 0x230   : > { %3289 = vmatmul.mubr.bf16.vlgmr.msra.gmra.mrb[24].mxu0 %v4291_v3  ;;  %3297 = vmatpush3.bf16.msra.mxu1 %v3632_v51  ;;  %v3637_v3 = vld [vmem:[#allocation8 + $0x168] sm:$0xff]  }
 0x231   : > { %3298 = vmatprep.subr.bf16.mxu1 %v3633_v54  ;;  %3220 = vmatprep.mubr.bf16.mxu1 %v1252_v47  ;;  %v3664_v51 = vld [vmem:[#allocation10 + $0x24] ss:$8 sps:$4 sm:$0xff]  }
 0x232   : > { %3292 = vmatprep.mubr.bf16.mxu0 %v1724_v63  ;;  %v3676_v47 = vld [vmem:[#allocation10 + $0x64] ss:$8 sps:$4 sm:$0xff]   ;;  %v3674_v63 = vld [vmem:[#allocation10 + $0x60] ss:$8 sps:$4 sm:$0xff]  }
 0x234   : > { %3299 = vmatpush3.bf16.msra.mxu1 %v3633_v54  ;;  %v3671_v54 = vld [vmem:[#allocation10 + $0x50] ss:$8 sps:$4 sm:$0xff]  }
 0x235   : > { %3300 = vmatprep.subr.bf16.mxu1 %v3634_v11 }
 0x237   : > { %3221 = vmatmul.mubr.bf16.gmra.mrb[4].mxu1 %v1261_v33 }
 0x238   : > { %3293 = vmatmul.mubr.bf16.gmra.mrb[28].mxu0 %v1726_v1  ;;  %3301 = vmatpush3.bf16.msra.mxu1 %v3634_v11  ;;  %v4397_v11 = vshrl.u32 %v697_v37, 7 }
 0x239   : > { %3302 = vmatprep.subr.bf16.mxu1 %v3635_v7  ;;  %3312 = vmatprep.mubr.bf16.mxu1 %v4276_v58  ;;  %v1923_v58 = vrot.slane %v1921_v6, 5 }
 0x23a   : > { %2552 = vmatprep.mubr.bf16.mxu0 %v3891_v0  ;;  %v700_v33 = vadd.s32 16, %v4397_v11 }
 0x23b   : > { %v1924_v30 = vor.u32 %v1923_v58, %v1920_v12 }
 0x23c   : > { %3303 = vmatpush3.bf16.msra.mxu1 %v3635_v7  ;;  %v724_v1 = vand.u32 15, %v700_v33  ;;  %v710_v7 = vand.u32 15, %v4397_v11 }
 0x23d   : > { %3304 = vmatprep.subr.bf16.mxu1 %v3636_v61  ;;  %v1925_v17 = vsel %vm1896_vm2, %v4315_v62, %v1924_v30  ;;  %v2057_v62 = vshrl.u32 %v1860_v45, 16 }
 0x23e   : > { %vm804_vm3 = vcmp.ne.s32.totalorder %v724_v1, 0  ;;  %vm802_vm4 = vcmp.ne.s32.totalorder %v710_v7, 0 }
 0x23f   : > { %v2059_v34 = vrot.slane %v2057_v62, 4 }
 0x240   : > { %3305 = vmatpush3.bf16.msra.mxu1 %v3636_v61  ;;  %v704_v61 = vadd.s32 48, %v4397_v11 }
 0x241   : > { %3306 = vmatprep.subr.bf16.mxu1 %v3637_v3 }
 0x242   : > { %v752_v5 = vand.u32 15, %v704_v61 }
 0x244   : > { %3307 = vmatpush3.bf16.msra.mxu1 %v3637_v3  ;;  %v702_v3 = vadd.s32 32, %v4397_v11  ;;  %vm808_vm5 = vcmp.ne.s32.totalorder %v752_v5, 0 }
 0x245   : > { %3308 = vmatprep.subr.bf16.mxu1 %v3638_v15 }
 0x248   : > { %3309 = vmatpush3.bf16.msra.mxu1 %v3638_v15  ;;  %v3894_v15 = vmov 0.0  }
 0x249   : > { %3310 = vmatprep.subr.bf16.mxu1 %v3639_v57  ;;  %v2864_v4 = vsel %vm802_vm4, 1.0, %v3894_v15 }
 0x24c   : > { %3311 = vmatpush3.bf16.msra.mxu1 %v3639_v57  ;;  %v2865_v57 = vsel %vm804_vm3, 1.0, %v3894_v15 }
 0x24d   : > { %3320 = vmatprep.subr.bf16.mxu1 %v3640_v53 }
 0x24f   : > { %3313 = vmatmul.mubr.bf16.vlgmr.msra.gmra.mrb[8].mxu1 %v4281_v59 }
 0x250   : > { %3321 = vmatpush3.bf16.msra.mxu1 %v3640_v53  ;;  %3316 = vmatprep.mubr.bf16.mxu1 %v4320_v56  ;;  %v738_v53 = vand.u32 15, %v702_v3 }
 0x251   : > { %3322 = vmatprep.subr.bf16.mxu1 %v3641_v14 }
 0x252   : > { %vm806_vm6 = vcmp.ne.s32.totalorder %v738_v53, 0 }
 0x254   : > { %3323 = vmatpush3.bf16.msra.mxu1 %v3641_v14 }
 0x255   : > { %3324 = vmatprep.subr.bf16.mxu1 %v3642_v16 }
 0x257   : > { %3317 = vmatmul.mubr.bf16.gmra.mrb[12].mxu1 %v1925_v17 }
 0x258   : > { %3325 = vmatpush3.bf16.msra.mxu1 %v3642_v16  ;;  %3336 = vmatprep.mubr.bf16.mxu1 %v4323_v9  ;;  %v2062_v9 = vrot.slane %v2060_v32, 5  ;;  %v2867_v32 = vsel %vm808_vm5, 1.0, %v3894_v15 }
 0x259   : > { %3326 = vmatprep.subr.bf16.mxu1 %v3643_v18 }
 0x25a   : > { %v2063_v36 = vor.u32 %v2062_v9, %v2059_v34 }
 0x25c   : > { %3327 = vmatpush3.bf16.msra.mxu1 %v3643_v18  ;;  %v2064_v39 = vsel %vm1896_vm2, %v4258_v52, %v2063_v36  ;;  %v3656_v52 = vld [vmem:[#allocation10] ss:$8 sps:$4 sm:$0xff]  }
 0x25d   : > { %3328 = vmatprep.subr.bf16.mxu1 %v3644_v27  ;;  %2521 = vmatpush1.bf16.msra.mxu0 %v3656_v52 }
 0x260   : > { %3329 = vmatpush3.bf16.msra.mxu1 %v3644_v27 }
 0x261   : > { %3330 = vmatprep.subr.bf16.mxu1 %v3645_v28 }
 0x264   : > { %3331 = vmatpush3.bf16.msra.mxu1 %v3645_v28 }
 0x265   : > { %3332 = vmatprep.subr.bf16.mxu1 %v3646_v44 }
 0x268   : > { %3333 = vmatpush3.bf16.msra.mxu1 %v3646_v44 }
 0x269   : > { %3334 = vmatprep.subr.bf16.mxu1 %v3647_v29 }
 0x26c   : > { %3335 = vmatpush3.bf16.msra.mxu1 %v3647_v29 }
 0x26d   : > { %3344 = vmatprep.subr.bf16.mxu1 %v3648_v49 }
 0x26f   : > { %3337 = vmatmul.mubr.bf16.vlgmr.msra.gmra.mrb[8].mxu1 %v4327_v10  ;;  %v3653_v10 = vld [vmem:[#allocation8 + $0x228] sm:$0xff]  }
 0x270   : > { %3345 = vmatpush3.bf16.msra.mxu1 %v3648_v49  ;;  %3340 = vmatprep.mubr.bf16.mxu1 %v4281_v59  ;;  %v3654_v59 = vld [vmem:[#allocation8 + $0x230] sm:$0xff]   ;;  %v2866_v49 = vsel %vm806_vm6, 1.0, %v3894_v15 }
 0x271   : > { %3346 = vmatprep.subr.bf16.mxu1 %v3649_v35 }
 0x274   : > { %3347 = vmatpush3.bf16.msra.mxu1 %v3649_v35 }
 0x275   : > { %3348 = vmatprep.subr.bf16.mxu1 %v3650_v38 }
 0x277   : > { %3341 = vmatmul.mubr.bf16.gmra.mrb[12].mxu1 %v2064_v39 }
 0x278   : > { %3349 = vmatpush3.bf16.msra.mxu1 %v3650_v38  ;;  %3360 = vmatprep.mubr.bf16.mxu1 %v4351_v2  ;;  %v3661_v2 = vld [vmem:[#allocation10 + $0x14] ss:$8 sps:$4 sm:$0xff]  }
 0x279   : > { %3350 = vmatprep.subr.bf16.mxu1 %v3651_v40  ;;  %2522 = vmatprep.subr.bf16.mxu0 %v3661_v2 }
 0x27a   : > { %2523 = vmatpush1.bf16.msra.mxu0 %v3659_v46  ;;  %v701_v46 = vadd.s32 24, %v4397_v11 }
 0x27b   : > { %2524 = vmatprep.subr.bf16.mxu0 %v3664_v51  ;;  %v699_v51 = vadd.s32 8, %v4397_v11 }
 0x27c   : > { %3351 = vmatpush3.bf16.msra.mxu1 %v3651_v40 }
 0x27d   : > { %3352 = vmatprep.subr.bf16.mxu1 %v3652_v41 }
 0x27e   : > { %2525 = vmatpush1.bf16.msra.mxu0 %v3662_v55  ;;  %v731_v55 = vand.u32 15, %v701_v46 }
 0x27f   : > { %2526 = vmatprep.subr.bf16.mxu0 %v3667_v60  ;;  %v717_v60 = vand.u32 15, %v699_v51  ;;  %v2436_v51 = vsub.s32 1, %v4397_v11 }
 0x280   : > { %3353 = vmatpush3.bf16.msra.mxu1 %v3652_v41  ;;  %vm829_vm7 = vcmp.ne.s32.totalorder %v731_v55, 15 }
 0x281   : > { %3354 = vmatprep.subr.bf16.mxu1 %v3653_v10  ;;  %vm827_vm8 = vcmp.ne.s32.totalorder %v717_v60, 15 }
 0x282   : > { %2527 = vmatpush1.bf16.msra.mxu0 %v3665_v31  ;;  %v705_v31 = vadd.s32 56, %v4397_v11 }
 0x284   : > { %3355 = vmatpush3.bf16.msra.mxu1 %v3653_v10 }
 0x285   : > { %3356 = vmatprep.subr.bf16.mxu1 %v3654_v59 }
 0x288   : > { %3357 = vmatpush3.bf16.msra.mxu1 %v3654_v59 }
 0x289   : > { %3358 = vmatprep.subr.bf16.mxu1 %v3655_v42 }
 0x28c   : > { %3359 = vmatpush3.bf16.msra.mxu1 %v3655_v42 }
 0x28f   : > { %3361 = vmatmul.mubr.bf16.vlgmr.msra.gmra.mrb[8].mxu1 %v4320_v56  ;;  %v3670_v56 = vld [vmem:[#allocation10 + $0x44] ss:$8 sps:$4 sm:$0xff]  }
 0x290   : > { %3364 = vmatprep.mubr.bf16.mxu1 %v4358_v8  ;;  %2528 = vmatprep.subr.bf16.mxu0 %v3670_v56  ;;  %v3673_v8 = vld [vmem:[#allocation10 + $0x54] ss:$8 sps:$4 sm:$0xff]   ;;  %v703_v56 = vadd.s32 40, %v4397_v11 }
 0x291   : > { %2529 = vmatpush1.bf16.msra.mxu0 %v3668_v50 }
 0x292   : > { %2530 = vmatprep.subr.bf16.mxu0 %v3673_v8  ;;  %v2869_v8 = vsel %vm829_vm7, 1.0, %v3894_v15  ;;  %v745_v1 = vand.u32 15, %v703_v56 }
 0x294   : > { %vm831_vm10 = vcmp.ne.s32.totalorder %v745_v1, 15 }
 0x295   : > { %2531 = vmatpush1.bf16.msra.mxu0 %v3671_v54 }
 0x296   : > { %2532 = vmatprep.subr.bf16.mxu0 %v3676_v47 }
 0x297   : > { %3365 = vmatmul.mubr.bf16.gmra.mrb[12].mxu1 %v4371_v48  ;;  %v3677_v48 = vld [vmem:[#allocation10 + $0x70] ss:$8 sps:$4 sm:$0xff]  }
 0x299   : > { %2533 = vmatpush1.bf16.msra.mxu0 %v3674_v63  ;;  %v2868_v63 = vsel %vm827_vm8, 1.0, %v3894_v15 }
 0x29a   : > { %2534 = vmatprep.subr.bf16.mxu0 %v3679_v13  ;;  %v759_v13 = vand.u32 15, %v705_v31  ;;  %v2412_v31 = vunpack.c.l.bf16 %v4190_v20 }
 0x29c   : > { %vm833_vm9 = vcmp.ne.s32.totalorder %v759_v13, 15  ;;  %v2415_v13 = vunpack.c.h.bf16 %v4186_v19 }
 0x29d   : > { %2535 = vmatpush1.bf16.msra.mxu0 %v3677_v48  ;;  %v2944_v48 = vld [vmem:[%s4538_s4] ss:$0 sm:$0xff] }
 0x302   : > { %v3218_v6 = vpop.f32.mrb[0].mxu1 }
 0x303   : > { %v1389_v12 = vmul.f32 %v3218_v6, %v2865_v57  ;;  %v3290_v58 = vpop.f32.mrb[24].mxu0  ;;  %v1348_v14 = vpop.f32.mrb[1].mxu1 }
 0x304   : > { %v1387_v30 = vmul.f32 %v2864_v4, %v1348_v14  ;;  %v1813_v16 = vpop.f32.mrb[25].mxu0  ;;  %v3219_v17 = vpop.f32.mrb[2].mxu1  ;;  %v2871_v14 = vsel %vm833_vm9, 1.0, %v3894_v15 }
 0x305   : > { %v1854_v18 = vadd.f32 %v3290_v58, %v1389_v12  ;;  %v3291_v27 = vpop.f32.mrb[26].mxu0  ;;  %v1351_v28 = vpop.f32.mrb[3].mxu1 }
 0x306   : > { %v1852_v44 = vadd.f32 %v1813_v16, %v1387_v30  ;;  %v1855_v29 = vadd.f32 %v3291_v27, %v3219_v17  ;;  %v1816_v45 = vpop.f32.mrb[27].mxu0  ;;  %v2870_v27 = vsel %vm831_vm10, 1.0, %v3894_v15 }
 0x307   : > { %v1853_v62 = vadd.f32 %v1816_v45, %v1351_v28 }
 0x30a   : > { %v3222_v34 = vpop.f32.mrb[4].mxu1 }
 0x30b   : > { %v1393_v9 = vmul.f32 %v3222_v34, %v2867_v32  ;;  %v3294_v35 = vpop.f32.mrb[28].mxu0  ;;  %v1364_v36 = vpop.f32.mrb[5].mxu1 }
 0x30c   : > { %v1391_v38 = vmul.f32 %v2866_v49, %v1364_v36  ;;  %v1829_v39 = vpop.f32.mrb[29].mxu0  ;;  %v3223_v40 = vpop.f32.mrb[6].mxu1 }
 0x30d   : > { %v1858_v41 = vadd.f32 %v3294_v35, %v1393_v9  ;;  %v3295_v10 = vpop.f32.mrb[30].mxu0  ;;  %v1367_v59 = vpop.f32.mrb[7].mxu1 }
 0x30e   : > { %v1856_v42 = vadd.f32 %v1829_v39, %v1391_v38  ;;  %v1859_v52 = vadd.f32 %v3295_v10, %v3223_v40  ;;  %v1832_v43 = vpop.f32.mrb[31].mxu0 }
 0x30f   : > { %v1857_v2 = vadd.f32 %v1832_v43, %v1367_v59 }
 0x362   : > { %v3362_v50 = vpop.f32.mrb[8].mxu1 }
 0x363   : > { %v2363_v54 = vadd.f32 %v3362_v50, %v1854_v18  ;;  %v2314_v47 = vpop.f32.mrb[9].mxu1  ;;  %v2413_v50 = vunpack.c.l.bf16 %v4186_v19  ;;  %v2417_v19 = vunpack.c.l.bf16 %v4193_v21 }
 0x364   : > { %v2361_v37 = vadd.f32 %v2314_v47, %v1852_v44  ;;  %v3363_v33 = vpop.f32.mrb[10].mxu1 }
 0x365   : > { %v2356_v7 = vmul.f32 %v3363_v33, %v2869_v8  ;;  %v2317_v61 = vpop.f32.mrb[11].mxu1  ;;  %v2378_v57 = vadd.f32 %v2944_v48, %v2363_v54  ;;  %v2414_v54 = vunpack.c.h.bf16 %v4190_v20  ;;  %v2416_v20 = vunpack.c.l.bf16 %v4198_v22 }
 0x366   : > { %v2354_v3 = vmul.f32 %v2868_v63, %v2317_v61  ;;  %v2376_v5 = vadd.f32 %v2944_v48, %v2361_v37 }
 0x367   : > { %v2364_v4 = vadd.f32 %v2356_v7, %v1855_v29  ;;  %v2386_v30 = vmax.f32 %v2378_v57, 0.0 }
 0x368   : > { %v2362_v6 = vadd.f32 %v2354_v3, %v1853_v62  ;;  %v2384_v28 = vmax.f32 %v2376_v5, 0.0 }
 0x369   : > { %v2379_v53 = vadd.f32 %v2944_v48, %v2364_v4 }
 0x36a   : > { %v2377_v12 = vadd.f32 %v2944_v48, %v2362_v6  ;;  %v3366_v58 = vpop.f32.mrb[12].mxu1 }
 0x36b   : > { %v2387_v16 = vmax.f32 %v2379_v53, 0.0  ;;  %v2367_v17 = vadd.f32 %v3366_v58, %v1858_v41  ;;  %v2330_v18 = vpop.f32.mrb[13].mxu1 }
 0x36c   : > { %v2385_v44 = vmax.f32 %v2377_v12, 0.0  ;;  %v2365_v45 = vadd.f32 %v2330_v18, %v1856_v42  ;;  %v3367_v32 = vpop.f32.mrb[14].mxu1  ;;  %v2419_v18 = vunpack.c.h.bf16 %v4193_v21 }
 0x36d   : > { %v2360_v29 = vmul.f32 %v3367_v32, %v2871_v14  ;;  %v2333_v49 = vpop.f32.mrb[15].mxu1  ;;  %v2393_v34 = vpack.c.bf16 %v2387_v16, %v2386_v30  ;;  %v2382_v35 = vadd.f32 %v2944_v48, %v2367_v17  ;;  %v2418_v14 = vunpack.c.h.bf16 %v4198_v22 }
 0x36e   : > { %v2392_v62 = vpack.c.bf16 %v2385_v44, %v2384_v28  ;;  %v2358_v9 = vmul.f32 %v2870_v27, %v2333_v49  ;;  %v2380_v38 = vadd.f32 %v2944_v48, %v2365_v45 }
 0x36f   : > { %v2368_v36 = vadd.f32 %v2360_v29, %v1859_v52  ;;  %v2390_v10 = vmax.f32 %v2382_v35, 0.0  ;;  %v2432_v52 = vsub.s32 0, %v4397_v11 }
 0x370   : > { %v2366_v39 = vadd.f32 %v2358_v9, %v1857_v2  ;;  %2553 = vmatmul.mubr.bf16.vlgmr.msra.gmra.mrb[32].mxu0 %v2392_v62  ;;  %v2388_v59 = vmax.f32 %v2380_v38, 0.0  ;;  %v2428_v2 = vld [vmem:[%s4540_s6] sm:$0x3]  ;;  %v2420_v9 = vunpack.c.l.bf16 %v4206_v24  ;;  %v2421_v38 = vunpack.c.l.bf16 %v4201_v23 }
 0x371   : > { %v2383_v40 = vadd.f32 %v2944_v48, %v2368_v36  ;;  %2562 = vmatprep.mubr.bf16.mxu0 %v3891_v0  ;;  %v4426_v55 = vrot.slane %v2428_v2, %v2432_v52  ;;  %v4428_v60 = vrot.slane %v2428_v2, %v2436_v51 }
 0x372   : > { %v2381_v41 = vadd.f32 %v2944_v48, %v2366_v39 }
 0x373   : > { %v2391_v15 = vmax.f32 %v2383_v40, 0.0 }
 0x374   : > { %v2389_v43 = vmax.f32 %v2381_v41, 0.0  ;;  %v2422_v41 = vunpack.c.h.bf16 %v4206_v24 }
 0x375   : > { %v2395_v42 = vpack.c.bf16 %v2391_v15, %v2390_v10 }
 0x376   : > { %v2394_v46 = vpack.c.bf16 %v2389_v43, %v2388_v59  ;;  %v2423_v43 = vunpack.c.h.bf16 %v4201_v23 }
 0x378   : > { %2563 = vmatmul.mubr.bf16.gmra.mrb[36].mxu0 %v2393_v34 }
 0x379   : > { %2572 = vmatprep.mubr.bf16.mxu0 %v3891_v0 }
 0x380   : > { %2573 = vmatmul.mubr.bf16.gmra.mrb[40].mxu0 %v2394_v46 }
 0x381   : > { %2582 = vmatprep.mubr.bf16.mxu0 %v3891_v0 }
 0x388   : > { %2583 = vmatmul.mubr.bf16.gmra.mrb[44].mxu0 %v2395_v42 }
 0x443   : > { %v2554_v56 = vpop.f32.mrb[32].mxu0 }
 0x444   : > { %v2555_v0 = vadd.f32 %v2554_v56, %v4426_v55  ;;  %v2556_v8 = vpop.f32.mrb[33].mxu0 }
 0x445   : > { %v2557_v47 = vadd.f32 %v2556_v8, %v4428_v60  ;;  %v2558_v63 = vpop.f32.mrb[34].mxu0  ;;  %v2424_v8 = vunpack.c.l.bf16 %v4214_v26 }
 0x446   : > { %v2593_v11 = vadd.f32 %v2555_v0, %v2412_v31  ;;  %v2559_v48 = vadd.f32 %v2558_v63, %v4426_v55  ;;  %v2560_v37 = vpop.f32.mrb[35].mxu0  ;;  %v2425_v63 = vunpack.c.l.bf16 %v4209_v25 }
 0x447   : > { %v2594_v33 = vadd.f32 %v2557_v47, %v2413_v50  ;;  %v2561_v1 = vadd.f32 %v2560_v37, %v4428_v60 }
 0x448   : > { %v2609_v7 = vmax.f32 %v2593_v11, 0.0  ;;  %v2595_v61 = vadd.f32 %v2559_v48, %v2414_v54  ;;  %v2426_v48 = vunpack.c.h.bf16 %v4214_v26 }
 0x449   : > { %v2610_v3 = vmax.f32 %v2594_v33, 0.0  ;;  %v2596_v57 = vadd.f32 %v2561_v1, %v2415_v13 }
 0x44a   : > { %v2611_v4 = vmax.f32 %v2595_v61, 0.0 }
 0x44b   : > { %v2983_v5 = vpack.c.bf16 %v2610_v3, %v2609_v7  ;;  %v2612_v6 = vmax.f32 %v2596_v57, 0.0  ;;  %v2564_v53 = vpop.f32.mrb[36].mxu0  ;;  %v2427_v7 = vunpack.c.h.bf16 %v4209_v25 }
 0x44c   : > { %v2565_v12 = vadd.f32 %v2564_v53, %v4426_v55  ;;  %v2566_v58 = vpop.f32.mrb[37].mxu0 }
 0x44d   : > { %2673 = vst [vmem:[%s4112_s21] sm:$0xff] %v2983_v5  ;;  %v2984_v30 = vpack.c.bf16 %v2612_v6, %v2611_v4  ;;  %v2567_v16 = vadd.f32 %v2566_v58, %v4428_v60  ;;  %v2568_v17 = vpop.f32.mrb[38].mxu0 }
 0x44e   : > { %v2597_v27 = vadd.f32 %v2565_v12, %v2416_v20  ;;  %v2569_v28 = vadd.f32 %v2568_v17, %v4426_v55  ;;  %v2570_v44 = vpop.f32.mrb[39].mxu0 }
 0x44f   : > { %2674 = vst [vmem:[%s4112_s21 + $0x8] sm:$0xff] %v2984_v30  ;;  %v2598_v45 = vadd.f32 %v2567_v16, %v2417_v19  ;;  %v2571_v32 = vadd.f32 %v2570_v44, %v4428_v60 }
 0x450   : > { %v2613_v29 = vmax.f32 %v2597_v27, 0.0  ;;  %v2599_v49 = vadd.f32 %v2569_v28, %v2418_v14 }
 0x451   : > { %v2614_v34 = vmax.f32 %v2598_v45, 0.0  ;;  %v2600_v22 = vadd.f32 %v2571_v32, %v2419_v18 }
 0x452   : > { %v2615_v62 = vmax.f32 %v2599_v49, 0.0 }
 0x453   : > { %v2985_v35 = vpack.c.bf16 %v2614_v34, %v2613_v29  ;;  %v2616_v36 = vmax.f32 %v2600_v22, 0.0  ;;  %v2574_v21 = vpop.f32.mrb[40].mxu0 }
 0x454   : > { %v2575_v39 = vadd.f32 %v2574_v21, %v4426_v55  ;;  %v2576_v40 = vpop.f32.mrb[41].mxu0 }
 0x455   : > { %2675 = vst [vmem:[%s4112_s21 + $0x10] sm:$0xff] %v2985_v35  ;;  %v2986_v10 = vpack.c.bf16 %v2616_v36, %v2615_v62  ;;  %v2577_v15 = vadd.f32 %v2576_v40, %v4428_v60  ;;  %v2578_v59 = vpop.f32.mrb[42].mxu0 }
 0x456   : > { %v2601_v42 = vadd.f32 %v2575_v39, %v2420_v9  ;;  %v2579_v46 = vadd.f32 %v2578_v59, %v4426_v55  ;;  %v2580_v52 = vpop.f32.mrb[43].mxu0 }
 0x457   : > { %2676 = vst [vmem:[%s4112_s21 + $0x18] sm:$0xff] %v2986_v10  ;;  %v2602_v2 = vadd.f32 %v2577_v15, %v2421_v38  ;;  %v2581_v51 = vadd.f32 %v2580_v52, %v4428_v60 }
 0x458   : > { %v2617_v31 = vmax.f32 %v2601_v42, 0.0  ;;  %v2603_v24 = vadd.f32 %v2579_v46, %v2422_v41 }
 0x459   : > { %v2618_v56 = vmax.f32 %v2602_v2, 0.0  ;;  %v2604_v50 = vadd.f32 %v2581_v51, %v2423_v43 }
 0x45a   : > { %v2619_v0 = vmax.f32 %v2603_v24, 0.0 }
 0x45b   : > { %v2987_v54 = vpack.c.bf16 %v2618_v56, %v2617_v31  ;;  %v2620_v23 = vmax.f32 %v2604_v50, 0.0  ;;  %v2584_v47 = vpop.f32.mrb[44].mxu0 }
 0x45c   : > { %v2585_v13 = vadd.f32 %v2584_v47, %v4426_v55  ;;  %v2586_v11 = vpop.f32.mrb[45].mxu0 }
 0x45d   : > { %2677 = vst [vmem:[%s4112_s21 + $0x20] sm:$0xff] %v2987_v54  ;;  %v2988_v37 = vpack.c.bf16 %v2620_v23, %v2619_v0  ;;  %v2587_v33 = vadd.f32 %v2586_v11, %v4428_v60  ;;  %v2588_v1 = vpop.f32.mrb[46].mxu0 }
 0x45e   : > { %v2605_v61 = vadd.f32 %v2585_v13, %v2424_v8  ;;  %v2589_v3 = vadd.f32 %v2588_v1, %v4426_v55  ;;  %v2590_v57 = vpop.f32.mrb[47].mxu0 }
 0x45f   : > { %2678 = vst [vmem:[%s4112_s21 + $0x28] sm:$0xff] %v2988_v37  ;;  %v2606_v4 = vadd.f32 %v2587_v33, %v2425_v63  ;;  %v2591_v26 = vadd.f32 %v2590_v57, %v4428_v60 }
 0x460   : > { %v2621_v20 = vmax.f32 %v2605_v61, 0.0  ;;  %v2607_v5 = vadd.f32 %v2589_v3, %v2426_v48 }
 0x461   : > { %v2622_v6 = vmax.f32 %v2606_v4, 0.0  ;;  %v2608_v53 = vadd.f32 %v2591_v26, %v2427_v7 }
 0x462   : > { %v2623_v25 = vmax.f32 %v2607_v5, 0.0 }
 0x463   : > { %v2989_v19 = vpack.c.bf16 %v2622_v6, %v2621_v20  ;;  %v2624_v12 = vmax.f32 %v2608_v53, 0.0 }
 0x465   : > { %2679 = vst [vmem:[%s4112_s21 + $0x30] sm:$0xff] %v2989_v19  ;;  %v2990_v55 = vpack.c.bf16 %v2624_v12, %v2623_v25 }
 0x467   : > { %2680 = vst [vmem:[%s4112_s21 + $0x38] sm:$0xff] %v2990_v55 }
 0x468   : > { %3777 = shalt.err (!%p3774_p2)
}
 0x469   : > { %s3778_s21 = scalar_lea.hbm %s4474_s13, 1024  ;;  %s3782_s12 = scalar_lea.hbm %s4541_s7, 8192 }
 0x46a   : > { %p3779_p0 = scmp.ne.s32.totalorder %s4474_s13, %s3778_s21  ;;  %p3783_p12 = scmp.lt.u32.totalorder %s4474_s13, %s4541_s7 }
 0x46b   : > { %p3784_p1 = scmp.lt.u32.totalorder %s3782_s12, %s3778_s21  ;;  %p3786_p5 = scmp.lt.u32.totalorder %s3778_s21, %s4474_s13 }
 0x46c   : > { %p3780_p8 = pnand %p3779_p0, %p4572_p6 }
 0x46d   : > { %p3785_p4 = por %p3784_p1, %p3783_p12 }
 0x46e   : > { %p3781_p10 = pneg %p3780_p8 }
 0x46f   : > { %p3787_p7 = por %p3786_p5, %p3785_p4 }
 0x471   : > { %p3788_p9 = pnand %p3787_p7, %p3781_p10 }
 0x473   : > { %3791 = shalt.err (!%p3788_p9)
}
 0x474   : > { %s3896_s24 = smov 128   ;;  %s3897_s19 = smov 8  }
 0x475   : > { %3452 = dma.vmem_to_hbm [thread:$0]  (%p4572_p6), %s4476_s10, 1024, %s4474_s13, %s4482_s26, %s3896_s24, %s3896_s24, %s3897_s19  }
 0x476 PF: > { %s4573_s27 = sld [smem:[#allocation22_spill]]  ;;  %s4574_s28 = sld [smem:[#allocation28_spill]] }
 0x477   : > { %p3476_p11 = scmp.ge.s32.totalorder %s3868_s8, 2 }
 0x47c   : > { %s2713_s17 = sand.u32 1, %s4573_s27   ;;  %p4575_p13 = scmp.ne.s32.totalorder %s4574_s28, 0 }
 0x47d   : > { %s2714_s22 = scalar_lea.sflag [#allocation7], %s2713_s17 }
 0x47e   : > { %p3465_p3 = pnand %p3476_p11, %p4575_p13 }
 0x480   : > { %3835 = dma.done.wait (!%p3465_p3), %s2714_s22, 1024  }
 0x481   : > { %3837 = vsyncadd (!%p3465_p3), %s2714_s22, 4294966272  ;;  %s22_s8 = sadd.s32 1, %s3868_s8   ;;  %s4576_s16 = sld [smem:[#allocation23_spill]] }
 0x482   : > { %p19_p2 = scmp.ge.s32.totalorder %s22_s8, 10   ;;  %s4577_s26 = sld [smem:[#allocation29_spill]] }
 0x483   : > { %s4578_s27 = sld [smem:[#allocation24_spill]]  ;;  %s4579_s28 = sld [smem:[#allocation25_spill]] }
 0x484   : > { %s4580_s29 = sld [smem:[#allocation26_spill]]  ;;  %s4581_s30 = sld [smem:[#allocation27_spill]] }
 0x485   : > { %s4582_s24 = smov %s3844_s25  ;;  %21 = sbr.rel (!%p19_p2) target bundleno = 7 (0x7), region = 136 }
 0x487   : > { %s4583_s25 = smov %s4576_s16 }
 0x48c   :  { %2719 = vsyncpa [#allocation6], 1 }
 0x48d   :  { %2721 = vsyncpa [#allocation6 + $0x1], 1 }
 0x48e   :  { %2722 = vsyncpa [#allocation9], 1 }
 0x48f   :  { %2723 = vsyncpa [#allocation7], 1 }
 0x490   :  { %2725 = vsyncpa [#allocation7 + $0x1], 1 }
 0x491   :  { %2726 = vsyncmov [#allocation4] }
 0x494   :  { %s2727_s15 = vpop.sfrf %2726 }
 0x495   :  { %p2976_p6 = scmp.ne.s32.totalorder %s2727_s15, 0 }
 0x497   :  { %2731 = shalt.err (%p2976_p6)  }
 0x498   :  { %2733 = vsyncmov [#allocation4 + $0x1] }
 0x49b   :  { %s2734_s10 = vpop.sfrf %2733 }
 0x49c   :  { %p2977_p0 = scmp.ne.s32.totalorder %s2734_s10, 0 }
 0x49e   :  { %2738 = shalt.err (%p2977_p0)  }

</bundles_post_ra>
